<compile_context>
chip_gen: v7x
topology: tpu7x:2x2x1
jax: 0.10.0
libtpu: 0.0.40
codegen_flags: <defaults>
</compile_context>

<pallas_src>
import math
from functools import partial

import jax
import jax.numpy as jnp
from jax import lax
from jax.experimental import pallas as pl
from jax.experimental.pallas import tpu as pltpu


def _round_up(x, m):
    return -(-x // m) * m


def _softplus(x):
    # == torch.nn.Softplus(beta=1) to <1e-8; overflow-safe without the threshold branch.
    return jnp.maximum(x, 0.0) + jnp.log1p(jnp.exp(-jnp.abs(x)))


# ---------------------------------------------------------------------------
# Kernel
# ---------------------------------------------------------------------------
def _ensemble_kernel(n_hidden, state_dim, layer_widths, x_ref, *refs):
    """refs = (W0, ..., W_{n_hidden-1}, Whead, bias_slab, out_ref)

    - W* are bf16, lane-dense padded [in_pad, out_pad] (out_pad a multiple of 128).
    - bias_slab is f32 [n_hidden + 3, slab_w]:
        rows 0..n_hidden-1 : hidden-layer biases (zero padded)
        row  n_hidden      : fused head bias (mean | logvar | zeros)
        row  n_hidden + 1  : max_logvar placed at lanes [S, 2S), finite elsewhere
        row  n_hidden + 2  : min_logvar placed at lanes [S, 2S), finite elsewhere
    - out_ref is the packed lane-dense [tm, head_pad] tile:
        lanes [0, S) = means, [S, 2S) = variances, rest = don't-care (finite).
    """
    out_ref = refs[-1]
    bias_ref = refs[-2]
    w_refs = refs[:-2]

    h = x_ref[...].astype(jnp.bfloat16)          # no-op when x is already bf16

    # --- model_core: [Linear, LeakyReLU] * n_hidden (unrolled, f32 accumulate) ---
    for i in range(n_hidden):
        w = layer_widths[i]
        b = bias_ref[i:i + 1, :w]                                   # f32 (1, w)
        h = jnp.dot(h, w_refs[i][...], preferred_element_type=jnp.float32) + b
        h = jnp.maximum(h, 0.01 * h)             # LeakyReLU (torch default slope)
        h = h.astype(jnp.bfloat16)               # back to MXU-native for next layer

    # --- fused mean|logvar head: one lane-dense matmul ---
    hw = layer_widths[n_hidden]
    bhead = bias_ref[n_hidden:n_hidden + 1, :hw]
    max_lv = bias_ref[n_hidden + 1:n_hidden + 2, :hw]
    min_lv = bias_ref[n_hidden + 2:n_hidden + 3, :hw]

    head = jnp.dot(h, w_refs[n_hidden][...],
                   preferred_element_type=jnp.float32) + bhead      # f32 (tm, hw)

    # logvar clamp + exp on the whole lane-dense tile (pure VPU/EUP, no sub-lane
    # slices / concatenates); means lanes are re-selected with a lane mask.
    lv = max_lv - _softplus(max_lv - head)
    lv = min_lv + _softplus(lv - min_lv)
    var = jnp.exp(lv)

    lane = lax.broadcasted_iota(jnp.int32, head.shape, 1)
    out_ref[...] = jnp.where(lane < state_dim, head, var).astype(out_ref.dtype)


# ---------------------------------------------------------------------------
# Wrapper
# ---------------------------------------------------------------------------
def _pick_tm(n, tm_max=1024):
    """Large row tile to amortize ~0.35us/step pipeline overhead, capped so the
    grid keeps >= 2 steps (v7x megacore) when n allows.  Multiples of 128 keep
    bf16/f32 sublane tiling happy and output stores unmasked."""
    half = -(-n // 2)
    target = _round_up(half, 128)
    return int(max(128, min(tm_max, target)))


def ensemble_member_forward(x, params, *, tm=None, tm_max=1024):
    """x: [n, total_dim] (bf16 preferred; f32 accepted).  params from
    prepare_kernel_params().  Returns (means [n, S] f32, variances [n, S] f32)."""
    weights = params["weights"]
    bias_slab = params["bias_slab"]
    layer_widths = params["layer_widths"]
    state_dim = params["state_dim"]
    n_hidden = len(weights) - 1
    n, in_dim = x.shape
    head_pad = layer_widths[-1]

    if tm is None:
        tm = _pick_tm(n, tm_max)
    grid = (pl.cdiv(n, tm),)                     # partial tail block masked by Pallas

    x_spec = pl.BlockSpec((tm, in_dim), lambda i: (i, 0))
    w_specs = [pl.BlockSpec(w.shape, lambda i: (0, 0)) for w in weights]   # resident
    b_spec = pl.BlockSpec(bias_slab.shape, lambda i: (0, 0))               # resident
    out_spec = pl.BlockSpec((tm, head_pad), lambda i: (i, 0))              # lane-dense

    flops = 2 * n * sum(int(w.shape[0]) * int(w.shape[1]) for w in weights)
    bytes_accessed = (x.size * x.dtype.itemsize
                      + sum(int(w.size) * w.dtype.itemsize for w in weights)
                      + int(bias_slab.size) * 4
                      + n * head_pad * 4)
    cost = pl.CostEstimate(flops=int(flops),
                           transcendentals=int(5 * n * head_pad),
                           bytes_accessed=int(bytes_accessed))

    kernel = partial(_ensemble_kernel, n_hidden, state_dim, layer_widths)
    packed = pl.pallas_call(
        kernel,
        grid=grid,
        in_specs=[x_spec] + w_specs + [b_spec],
        out_specs=out_spec,
        out_shape=jax.ShapeDtypeStruct((n, head_pad), jnp.float32),
        compiler_params=pltpu.CompilerParams(
            dimension_semantics=("parallel",),
            vmem_limit_bytes=32 * 1024 * 1024,   # safe on v5e/v6e (128 MiB) and v7x (64 MiB)
        ),
        cost_estimate=cost,
    )(x, *weights, bias_slab)

    return packed[:, :state_dim], packed[:, state_dim:2 * state_dim]


# ---------------------------------------------------------------------------
# Deterministic parameter construction (mirrors EnsembleMember.__init__/init_layers)
# ---------------------------------------------------------------------------
def xavier_uniform(key, fan_in, fan_out, gain):
    # torch.nn.init.xavier_uniform_ on a [out, in] weight; built transposed [in, out]
    # directly (same distribution; symmetric in fan_in/fan_out).
    a = gain * math.sqrt(6.0 / (fan_in + fan_out))
    return jax.random.uniform(key, (fan_in, fan_out), jnp.float32, -a, a)


def build_raw_params(key, state_dim, mu_dim, action_dim, hidden_dims):
    total_dim = state_dim + mu_dim + action_dim
    dims = [total_dim] + list(hidden_dims)
    gain = math.sqrt(2.0)
    keys = jax.random.split(key, len(dims) + 1)
    core = []
    for i in range(len(dims) - 1):
        W = xavier_uniform(keys[i], dims[i], dims[i + 1], gain)
        b = jnp.zeros((1, dims[i + 1]), jnp.float32)
        core.append((W, b))
    Wm = xavier_uniform(keys[-2], hidden_dims[-1], state_dim, gain)
    bm = jnp.zeros((1, state_dim), jnp.float32)
    Wl = xavier_uniform(keys[-1], hidden_dims[-1], state_dim, gain)
    bl = jnp.zeros((1, state_dim), jnp.float32)
    max_logvar = jnp.ones((1, state_dim), jnp.float32)
    min_logvar = -jnp.ones((1, state_dim), jnp.float32)
    return core, (Wm, bm, Wl, bl), (max_logvar, min_logvar)


def prepare_kernel_params(core, heads, bounds, weight_dtype=jnp.bfloat16):
    """Lane-dense packing:
       * every hidden layer / the fused mean|logvar head padded to multiples of 128
         output lanes (padded weight columns & biases are EXACTLY zero so padded
         activations stay 0 and padded logvars stay finite through exp);
       * heads fused into one weight [hidden_pad, head_pad] = [mean | logvar | 0];
       * all biases + logvar bounds packed into a single f32 slab."""
    Wm, bm, Wl, bl = heads
    max_logvar, min_logvar = bounds
    S = Wm.shape[1]

    hidden_pads = [_round_up(W.shape[1], 128) for W, _ in core]
    head_pad = _round_up(2 * S, 128)
    widths = hidden_pads + [head_pad]
    slab_w = max(widths)

    weights = []
    bias_rows = []
    prev = core[0][0].shape[0]                   # x is fed at its natural width
    for (W, b), wpad in zip(core, hidden_pads):
        Wp = jnp.zeros((prev, wpad), jnp.float32)
        Wp = Wp.at[:W.shape[0], :W.shape[1]].set(W)
        weights.append(Wp.astype(weight_dtype))
        bias_rows.append(jnp.zeros((slab_w,), jnp.float32).at[:W.shape[1]].set(b[0]))
        prev = wpad

    Wh = jnp.zeros((prev, head_pad), jnp.float32)
    Wh = Wh.at[:Wm.shape[0], :S].set(Wm).at[:Wl.shape[0], S:2 * S].set(Wl)
    weights.append(Wh.astype(weight_dtype))
    bias_rows.append(jnp.zeros((slab_w,), jnp.float32)
                     .at[:S].set(bm[0]).at[S:2 * S].set(bl[0]))

    # bounds broadcast to full head width; padded lanes get finite (+1 / -1) values
    # so the padded head columns remain finite through the clamp + exp.
    bias_rows.append(jnp.ones((slab_w,), jnp.float32).at[S:2 * S].set(max_logvar[0]))
    bias_rows.append((-jnp.ones((slab_w,), jnp.float32)).at[S:2 * S].set(min_logvar[0]))

    bias_slab = jnp.stack(bias_rows, axis=0)     # f32 [n_hidden + 3, slab_w]

    return {"weights": weights, "bias_slab": bias_slab,
            "layer_widths": tuple(int(w) for w in widths), "state_dim": int(S)}


# ---------------------------------------------------------------------------
# Pure-JAX reference on the RAW (unfused, unpadded) params, with the same bf16
# weight/activation quantization, so the check isolates the kernel's packing.
# ---------------------------------------------------------------------------
def reference_forward(x, core, heads, bounds):
    bf16 = lambda a: a.astype(jnp.bfloat16)
    h = x.astype(jnp.float32)
    for W, b in core:
        h = jnp.dot(bf16(h), bf16(W), preferred_element_type=jnp.float32) + b
        h = jnp.where(h > 0, h, 0.01 * h)
    Wm, bm, Wl, bl = heads
    max_lv, min_lv = bounds
    means = jnp.dot(bf16(h), bf16(Wm), preferred_element_type=jnp.float32) + bm
    logvars = jnp.dot(bf16(h), bf16(Wl), preferred_element_type=jnp.float32) + bl
    sp = lambda v: jnp.maximum(v, 0.0) + jnp.log1p(jnp.exp(-jnp.abs(v)))
    lv = max_lv - sp(max_lv - logvars)
    lv = min_lv + sp(lv - min_lv)
    return means, jnp.exp(lv)


if __name__ == "__main__":
    # shapes consistent with the module's forward
    state_dim, mu_dim, action_dim = 8, 16, 8          # total_dim = 32
    hidden_dims = [32, 32]
    n = 200                                           # exercises the masked tail block

    key = jax.random.PRNGKey(0)
    kx, kp = jax.random.split(key)
    total_dim = state_dim + mu_dim + action_dim
    # cast to bf16 once where x is produced (halves the kernel's input DMA bytes)
    x = jax.random.normal(kx, (n, total_dim), jnp.float32).astype(jnp.bfloat16)

    core, heads, bounds = build_raw_params(kp, state_dim, mu_dim, action_dim, hidden_dims)
    params = prepare_kernel_params(core, heads, bounds)

    means, variances = ensemble_member_forward(x, params)
    jax.block_until_ready((means, variances))

    ref_means, ref_vars = reference_forward(x, core, heads, bounds)
    assert means.shape == (n, state_dim) and variances.shape == (n, state_dim)
    assert jnp.allclose(means, ref_means, atol=2e-3, rtol=2e-3)
    assert jnp.allclose(variances, ref_vars, atol=2e-3, rtol=2e-3)

    print("KERNEL_OK")
</pallas_src>

<mosaic_0001>
module attributes {stable_mosaic.version = 11 : i64} {
  func.func @_ensemble_kernel(%arg0: i32, %arg1: memref<128x32xbf16, #tpu.memory_space<vmem>>, %arg2: memref<32x128xbf16, #tpu.memory_space<vmem>>, %arg3: memref<128x128xbf16, #tpu.memory_space<vmem>>, %arg4: memref<128x128xbf16, #tpu.memory_space<vmem>>, %arg5: memref<5x128xf32, #tpu.memory_space<vmem>>, %arg6: memref<128x128xf32, #tpu.memory_space<vmem>>) attributes {dimension_semantics = [#tpu.dimension_semantics<parallel>], iteration_bounds = array<i64: 2>, scalar_prefetch = 0 : i64, scratch_operands = 0 : i64, tpu.core_type = #tpu.core_type<tc>, window_params = [{transform_indices = @transform_0, window_bounds = array<i64: 128, 32>}, {pipeline_mode = #tpu.pipeline_mode<synchronous>, transform_indices = @transform_1, window_bounds = array<i64: 32, 128>}, {pipeline_mode = #tpu.pipeline_mode<synchronous>, transform_indices = @transform_2, window_bounds = array<i64: 128, 128>}, {pipeline_mode = #tpu.pipeline_mode<synchronous>, transform_indices = @transform_3, window_bounds = array<i64: 128, 128>}, {pipeline_mode = #tpu.pipeline_mode<synchronous>, transform_indices = @transform_4, window_bounds = array<i64: 5, 128>}, {transform_indices = @transform_5, window_bounds = array<i64: 128, 128>}]} {
    %c0 = arith.constant 0 : index
    %c0_0 = arith.constant 0 : index
    %0 = vector.load %arg1[%c0, %c0_0] : memref<128x32xbf16, #tpu.memory_space<vmem>>, vector<128x32xbf16>
    %c0_1 = arith.constant 0 : index
    %c0_2 = arith.constant 0 : index
    %1 = vector.load %arg5[%c0_1, %c0_2] : memref<5x128xf32, #tpu.memory_space<vmem>>, vector<1x128xf32>
    %c0_3 = arith.constant 0 : index
    %c0_4 = arith.constant 0 : index
    %2 = vector.load %arg2[%c0_3, %c0_4] : memref<32x128xbf16, #tpu.memory_space<vmem>>, vector<32x128xbf16>
    %cst = arith.constant dense<0.000000e+00> : vector<128x128xf32>
    %3 = tpu.matmul %0, %2, %cst {dimension_numbers = #tpu.dot_dimension_numbers<[1], [0], [0], [1], [0, 0, 1, 1], [], []>} : vector<128x32xbf16>, vector<32x128xbf16>, vector<128x128xf32> -> vector<128x128xf32>
    %4 = vector.broadcast %1 : vector<1x128xf32> to vector<128x128xf32>
    %5 = arith.addf %3, %4 : vector<128x128xf32>
    %cst_5 = arith.constant 0.00999999977 : f32
    %6 = vector.broadcast %cst_5 : f32 to vector<128x128xf32>
    %7 = arith.mulf %6, %5 : vector<128x128xf32>
    %8 = arith.maximumf %5, %7 : vector<128x128xf32>
    %9 = arith.truncf %8 : vector<128x128xf32> to vector<128x128xbf16>
    %c1 = arith.constant 1 : index
    %c0_6 = arith.constant 0 : index
    %10 = vector.load %arg5[%c1, %c0_6] : memref<5x128xf32, #tpu.memory_space<vmem>>, vector<1x128xf32>
    %c0_7 = arith.constant 0 : index
    %c0_8 = arith.constant 0 : index
    %11 = vector.load %arg3[%c0_7, %c0_8] : memref<128x128xbf16, #tpu.memory_space<vmem>>, vector<128x128xbf16>
    %cst_9 = arith.constant dense<0.000000e+00> : vector<128x128xf32>
    %12 = tpu.matmul %9, %11, %cst_9 {dimension_numbers = #tpu.dot_dimension_numbers<[1], [0], [0], [1], [0, 0, 1, 1], [], []>} : vector<128x128xbf16>, vector<128x128xbf16>, vector<128x128xf32> -> vector<128x128xf32>
    %13 = vector.broadcast %10 : vector<1x128xf32> to vector<128x128xf32>
    %14 = arith.addf %12, %13 : vector<128x128xf32>
    %cst_10 = arith.constant 0.00999999977 : f32
    %15 = vector.broadcast %cst_10 : f32 to vector<128x128xf32>
    %16 = arith.mulf %15, %14 : vector<128x128xf32>
    %17 = arith.maximumf %14, %16 : vector<128x128xf32>
    %18 = arith.truncf %17 : vector<128x128xf32> to vector<128x128xbf16>
    %c2 = arith.constant 2 : index
    %c0_11 = arith.constant 0 : index
    %19 = vector.load %arg5[%c2, %c0_11] : memref<5x128xf32, #tpu.memory_space<vmem>>, vector<1x128xf32>
    %c3 = arith.constant 3 : index
    %c0_12 = arith.constant 0 : index
    %20 = vector.load %arg5[%c3, %c0_12] : memref<5x128xf32, #tpu.memory_space<vmem>>, vector<1x128xf32>
    %c4 = arith.constant 4 : index
    %c0_13 = arith.constant 0 : index
    %21 = vector.load %arg5[%c4, %c0_13] : memref<5x128xf32, #tpu.memory_space<vmem>>, vector<1x128xf32>
    %c0_14 = arith.constant 0 : index
    %c0_15 = arith.constant 0 : index
    %22 = vector.load %arg4[%c0_14, %c0_15] : memref<128x128xbf16, #tpu.memory_space<vmem>>, vector<128x128xbf16>
    %cst_16 = arith.constant dense<0.000000e+00> : vector<128x128xf32>
    %23 = tpu.matmul %18, %22, %cst_16 {dimension_numbers = #tpu.dot_dimension_numbers<[1], [0], [0], [1], [0, 0, 1, 1], [], []>} : vector<128x128xbf16>, vector<128x128xbf16>, vector<128x128xf32> -> vector<128x128xf32>
    %24 = vector.broadcast %19 : vector<1x128xf32> to vector<128x128xf32>
    %25 = arith.addf %23, %24 : vector<128x128xf32>
    %26 = vector.broadcast %20 : vector<1x128xf32> to vector<128x128xf32>
    %27 = arith.subf %26, %25 : vector<128x128xf32>
    %cst_17 = arith.constant 0.000000e+00 : f32
    %28 = vector.broadcast %cst_17 : f32 to vector<128x128xf32>
    %29 = arith.maximumf %27, %28 : vector<128x128xf32>
    %30 = math.absf %27 : vector<128x128xf32>
    %cst_18 = arith.constant 0.000000e+00 : f32
    %31 = vector.broadcast %cst_18 : f32 to vector<128x128xf32>
    %32 = arith.subf %31, %30 : vector<128x128xf32>
    %33 = math.exp %32 : vector<128x128xf32>
    %34 = math.log1p %33 : vector<128x128xf32>
    %35 = arith.addf %29, %34 : vector<128x128xf32>
    %36 = vector.broadcast %20 : vector<1x128xf32> to vector<128x128xf32>
    %37 = arith.subf %36, %35 : vector<128x128xf32>
    %38 = vector.broadcast %21 : vector<1x128xf32> to vector<128x128xf32>
    %39 = arith.subf %37, %38 : vector<128x128xf32>
    %cst_19 = arith.constant 0.000000e+00 : f32
    %40 = vector.broadcast %cst_19 : f32 to vector<128x128xf32>
    %41 = arith.maximumf %39, %40 : vector<128x128xf32>
    %42 = math.absf %39 : vector<128x128xf32>
    %cst_20 = arith.constant 0.000000e+00 : f32
    %43 = vector.broadcast %cst_20 : f32 to vector<128x128xf32>
    %44 = arith.subf %43, %42 : vector<128x128xf32>
    %45 = math.exp %44 : vector<128x128xf32>
    %46 = math.log1p %45 : vector<128x128xf32>
    %47 = arith.addf %41, %46 : vector<128x128xf32>
    %48 = vector.broadcast %21 : vector<1x128xf32> to vector<128x128xf32>
    %49 = arith.addf %48, %47 : vector<128x128xf32>
    %50 = math.exp %49 : vector<128x128xf32>
    %51 = tpu.iota {dimensions = array<i32: 1>} : vector<128x128xi32>
    %c8_i32 = arith.constant 8 : i32
    %52 = vector.broadcast %c8_i32 : i32 to vector<128x128xi32>
    %53 = arith.cmpi slt, %51, %52 : vector<128x128xi32>
    %54 = arith.select %53, %25, %50 : vector<128x128xi1>, vector<128x128xf32>
    %c0_21 = arith.constant 0 : index
    %c0_22 = arith.constant 0 : index
    %55 = vector.load %arg6[%c0_21, %c0_22] : memref<128x128xf32, #tpu.memory_space<vmem>>, vector<128x128xf32>
    tpu.vector_store %arg6[%c0_21, %c0_22], %54 {strides = array<i32>} : memref<128x128xf32, #tpu.memory_space<vmem>>, vector<128x128xf32>,
    return
  }
  func.func @transform_0(%arg0: i32) -> (i32, i32) {
    %c0_i32 = arith.constant 0 : i32
    %c0_i32_0 = arith.constant 0 : i32
    return %arg0, %c0_i32 : i32, i32
  }
  func.func @transform_1(%arg0: i32) -> (i32, i32) {
    %c0_i32 = arith.constant 0 : i32
    %c0_i32_0 = arith.constant 0 : i32
    %c0_i32_1 = arith.constant 0 : i32
    return %c0_i32, %c0_i32_0 : i32, i32
  }
  func.func @transform_2(%arg0: i32) -> (i32, i32) {
    %c0_i32 = arith.constant 0 : i32
    %c0_i32_0 = arith.constant 0 : i32
    %c0_i32_1 = arith.constant 0 : i32
    return %c0_i32, %c0_i32_0 : i32, i32
  }
  func.func @transform_3(%arg0: i32) -> (i32, i32) {
    %c0_i32 = arith.constant 0 : i32
    %c0_i32_0 = arith.constant 0 : i32
    %c0_i32_1 = arith.constant 0 : i32
    return %c0_i32, %c0_i32_0 : i32, i32
  }
  func.func @transform_4(%arg0: i32) -> (i32, i32) {
    %c0_i32 = arith.constant 0 : i32
    %c0_i32_0 = arith.constant 0 : i32
    %c0_i32_1 = arith.constant 0 : i32
    return %c0_i32, %c0_i32_0 : i32, i32
  }
  func.func @transform_5(%arg0: i32) -> (i32, i32) {
    %c0_i32 = arith.constant 0 : i32
    %c0_i32_0 = arith.constant 0 : i32
    return %arg0, %c0_i32 : i32, i32
  }
}

</mosaic_0001>

<bundles_post_ra>
// kernel: tpu_custom_call.1
= control target key start
LH: loop header
LB: loop body
LE: loop exit
PB: predicated region body
PF: predicated region fallthrough
CT: control target
= control target key end

     0   :  { %10 = vsyncpa [#allocation3], 0  ;;  %s2978_s0 = inlined_call_operand.vmem [shape: bf16[200,32], index: 0, kind: input, shape index: {}]   ;;  %s2979_s1 = inlined_call_operand.hbm [shape: bf16[32,128], index: 1, kind: input, shape index: {}]   ;;  %s2980_s2 = inlined_call_operand.vmem [shape: bf16[128,128], index: 2, kind: input, shape index: {}]   ;;  %s2981_s3 = inlined_call_operand.vmem [shape: bf16[128,128], index: 3, kind: input, shape index: {}]   ;;  %s2982_s4 = inlined_call_operand.vmem [shape: f32[5,128], index: 4, kind: input, shape index: {}]   ;;  %s2983_s5 = inlined_call_operand.hbm [shape: f32[200,128], index: 5, kind: output, shape index: {}]  }
   0x1   :  { %11 = vsyncpa [#allocation4], 0 }
   0x2   :  { %13 = vsyncpa [#allocation4 + $0x1], 0  ;;  %s2149_s18 = smov 0   ;;  %s2151_s19 = smov 0  }
   0x3   :  { %s2153_s20 = smov 0   ;;  %s2155_s21 = smov 0  }
   0x4 LB: > { %s2170_s22 = sadd.s32 4294967295, %s2111_s21   ;;  %s1592_s23 = sadd.s32 4294967294, %s2111_s21   ;;  %s2111_s21 = sphi %s2155_s21, %s3052_s21   ;;  %s2107_s20 = sphi %s2153_s20, %s3051_s20   ;;  %s2103_s19 = sphi %s2151_s19, %s3050_s19   ;;  %s2099_s18 = sphi %s2149_s18, %s3049_s18  }
   0x5   : > { %s2174_s24 = sadd.s32 1, %s2111_s21   ;;  %s136_s25 = sadd.s32 1, %s2107_s20 }
   0x6   : > { %s133_s26 = ssub.s32 %s2111_s21, %s2174_s24  ;;  %p146_p0 = scmp.ne.s32.totalorder %s2107_s20, %s2103_s19 }
   0x7   : > { %p134_p1 = scmp.eq.s32.totalorder %s133_s26, 0  ;;  %p147_p2 = scmp.eq.s32.totalorder %s2170_s22, 1 }
   0x8   : > { %p152_p3 = scmp.ne.s32.totalorder %s2103_s19, %s2099_s18  ;;  %p153_p4 = scmp.eq.s32.totalorder %s1592_s23, 1 }
   0x9   : > { %s2185_s27 = scalar_select %p134_p1, %s2107_s20, %s136_s25  }
   0xa   : > { %p2187_p5 = por %p147_p2, %p146_p0  ;;  %p2191_p6 = por %p153_p4, %p152_p3 }
   0xb   : > { %p1593_p7 = scmp.ge.s32.totalorder %s2111_s21, 1  ;;  %p160_p8 = scmp.lt.s32.totalorder %s2111_s21, 3 }
   0xc   : > { %s2987_s28 = scalar_select %p2187_p5, 1, 0 }
   0xd   : > { %s2988_s29 = scalar_select %p2191_p6, 1, 0 }
   0xe   : > { %p2984_p9 = scmp.eq.s32.totalorder %s2170_s22, 0  ;;  %p2198_p10 = pnand %p1593_p7, %p160_p8 }
   0xf   : > { %s2113_s6 = smov [#allocation2]   ;;  %s2017_s11 = scalar_lea.hbm %s2979_s1, 256 }
  0x10   : > { %s2989_s30 = scalar_select %p2198_p10, 1, 0 }
  0x11   : > { %s172_s7 = sshll.u32 %s2113_s6, 4  ;;  %p1781_p11 = pneg %p2198_p10  ;;  %s173_s7 = int_to_ptr.vmem [resolvable:$true] %s172_s7 }
  0x12   : > { %p2018_p13 = scmp.ne.s32.totalorder %s2979_s1, %s2017_s11  ;;  %p2024_p3 = scmp.lt.u32.totalorder %s2017_s11, %s2979_s1 }
  0x13   : > { %p2206_p12 = pnand %p2984_p9, %p1781_p11 }
  0x15   : > { %p2019_p0 = pneg %p2206_p12 }
  0x17   : > { %p2020_p1 = pnand %p2019_p0, %p2018_p13 }
  0x19   : > { %p2021_p2 = pneg %p2020_p1 }
  0x1b   : > { %p2026_p4 = pnand %p2024_p3, %p2021_p2 }
  0x1d   : > { %2029 = shalt.err (!%p2026_p4)
}
  0x1e   : > { %s2030_s16 = scalar_lea.vmem %s173_s7, 256  ;;  %p2038_p9 = scmp.lt.s32.totalorder %s173_s7, %s173_s7 }
  0x1f   : > { %p2031_p7 = scmp.ne.s32.totalorder %s173_s7, %s2030_s16  ;;  %p2039_p6 = scmp.lt.s32.totalorder %s2030_s16, %s2030_s16 }
  0x21   : > { %p2033_p8 = pnand %p2031_p7, %p2019_p0  ;;  %p2040_p5 = por %p2039_p6, %p2038_p9 }
  0x23   : > { %p2034_p11 = pneg %p2033_p8 }
  0x25   : > { %p2041_p10 = pnand %p2040_p5, %p2034_p11 }
  0x27   : > { %2044 = shalt.err (!%p2041_p10)
}
  0x28   : > { %s2114_s17 = smov 64   ;;  %s2115_s23 = smov 4  }
  0x29   : > { %1784 = dma.hbm_to_vmem [thread:$0]  (!%p2206_p12), %s2979_s1, 256, %s173_s7, [#allocation3], %s2114_s17, %s2114_s17, %s2115_s23  }
  0x2a   : > { %p2991_p13 = scmp.ne.s32.totalorder %s2989_s30, 0 }
  0x2c   : > { %214 = sbr.rel (%p2991_p13) target bundleno = 955 (0x3bb), region = 40 }
  0x33   : > { %p2992_p1 = scmp.eq.s32.totalorder %s2170_s22, 0 }
  0x35   : > { %2090 = dma.done.wait (%p2992_p1), [#allocation3], 256   ;;  %p2993_p0 = pmov %p2992_p1 }
  0x36   : > { %s2233_s6 = sshll.u32 %s2170_s22, 4  ;;  %v1829_v0 = vld [vmem:[#allocation2] sm:$0xff]   ;;  %v1830_v1 = vld [vmem:[#allocation2 + $0x8] sm:$0xff]   ;;  %vm343_vm0 = vcmask 261120   ;;  %v1841_v9 = vld [vmem:[%s2980_s2 + $0x10] sm:$0xff]   ;;  %s243_s17 = sand.u32 1, %s2103_s19  }
  0x37   : > { %2092 = vsyncadd (%p2993_p0), [#allocation3], 4294967040  ;;  %p251_p5 = scmp.lt.s32.totalorder %s2233_s6, 24  ;;  %1692 = vmatprep.subr.bf16.mxu0 %v1829_v0  ;;  %v1839_v5 = vld [vmem:[%s2980_s2] sm:$0xff]   ;;  %v1840_v6 = vld [vmem:[%s2980_s2 + $0x8] sm:$0xff]   ;;  %s1598_s11 = sshll.u32 %s243_s17, 7 }
  0x38   : > { %1693 = vmatpush3.bf16.msra.mxu0 %v1829_v0  ;;  %1712 = vmatprep.subr.bf16.mxu1 %v1839_v5  ;;  %v1842_v10 = vld [vmem:[%s2980_s2 + $0x18] sm:$0xff]   ;;  %v1843_v12 = vld [vmem:[%s2980_s2 + $0x20] sm:$0xff]   ;;  %v1844_v15 = vld [vmem:[%s2980_s2 + $0x28] sm:$0xff]   ;;  %s2733_s30 = scalar_lea.vmem [#allocation5], %s1598_s11  ;;  %s2917_s15 = scalar_lea.sflag [#allocation4], %s243_s17 }
  0x39   : > { %s252_s8 = scalar_select %p251_p5, %s2233_s6, 24  ;;  %1694 = vmatprep.subr.bf16.mxu0 %v1830_v1  ;;  %1713 = vmatpush3.bf16.msra.mxu1 %v1839_v5  ;;  %v1845_v16 = vld [vmem:[%s2980_s2 + $0x30] sm:$0xff]   ;;  %v1846_v17 = vld [vmem:[%s2980_s2 + $0x38] sm:$0xff]   ;;  %v1847_v18 = vld [vmem:[%s2981_s3] sm:$0xff]  }
  0x3a   : > { %1714 = vmatprep.subr.bf16.mxu1 %v1840_v6  ;;  %v1848_v19 = vld [vmem:[%s2981_s3 + $0x8] sm:$0xff]   ;;  %v1849_v20 = vld [vmem:[%s2981_s3 + $0x10] sm:$0xff]   ;;  %v1850_v21 = vld [vmem:[%s2981_s3 + $0x18] sm:$0xff]   ;;  %p3047_p6 = scmp.ne.s32.totalorder %s2987_s28, 0 }
  0x3b   : > { %s1600_s9 = sshll.u32 %s252_s8, 2  ;;  %v1851_v22 = vld [vmem:[%s2981_s3 + $0x20] sm:$0xff]   ;;  %s1507_s16 = ssub.s32 (%p3047_p6), 25, %s2233_s6 }
  0x3c   : > { %s2240_s7 = scalar_lea.vmem %s2978_s0, %s1600_s9  ;;  %1695 = vmatpush3.bf16.msra.mxu0 %v1830_v1  ;;  %v2300_v23 = vld [vmem:[%s2982_s4] ss:$0 sm:$0xff]  ;;  %p1508_p9 = scmp.lt.s32.totalorder (%p3047_p6), %s1507_s16, 16 }
  0x3d   : > { %v1831_v2 = vld [vmem:[%s2240_s7] sm:$0xff]   ;;  %v1832_v3 = vld [vmem:[%s2240_s7 + $0x8] sm:$0xff]   ;;  %v1833_v4 = vld [vmem:[%s2240_s7 + $0x10] sm:$0xff]   ;;  %1715 = vmatpush3.bf16.msra.mxu1 %v1840_v6  ;;  %1744 = vmatprep.subr.bf16.mxu0 %v1847_v18 }
  0x3e   : > { %1696 = vmatprep.mubr.msk.bf16.mxu0 %vm343_vm0, %v1831_v2  ;;  %v1834_v7 = vld [vmem:[%s2240_s7 + $0x18] sm:$0xff]   ;;  %v1835_v8 = vld [vmem:[%s2240_s7 + $0x20] sm:$0xff]   ;;  %1716 = vmatprep.subr.bf16.mxu1 %v1841_v9  ;;  %v1836_v11 = vld [vmem:[%s2240_s7 + $0x28] sm:$0xff]  }
  0x3f   : > { %1697 = vmatmul.mubr.msk.bf16.vlgmr.msra.gmra.mrb[0].mxu0 %vm343_vm0, %v1832_v3  ;;  %v1837_v13 = vld [vmem:[%s2240_s7 + $0x30] sm:$0xff]   ;;  %v1838_v14 = vld [vmem:[%s2240_s7 + $0x38] sm:$0xff]  }
  0x40   : > { %1700 = vmatprep.mubr.msk.bf16.mxu0 %vm343_vm0, %v1833_v4  ;;  %1745 = vmatpush3.bf16.msra.mxu0 %v1847_v18 }
  0x41   : > { %1717 = vmatpush3.bf16.msra.mxu1 %v1841_v9  ;;  %1746 = vmatprep.subr.bf16.mxu0 %v1848_v19 }
  0x42   : > { %1718 = vmatprep.subr.bf16.mxu1 %v1842_v10 }
  0x44   : > { %1747 = vmatpush3.bf16.msra.mxu0 %v1848_v19 }
  0x45   : > { %1719 = vmatpush3.bf16.msra.mxu1 %v1842_v10  ;;  %1748 = vmatprep.subr.bf16.mxu0 %v1849_v20 }
  0x46   : > { %1720 = vmatprep.subr.bf16.mxu1 %v1843_v12 }
  0x47   : > { %1701 = vmatmul.mubr.msk.bf16.gmra.mrb[4].mxu0 %vm343_vm0, %v1834_v7 }
  0x48   : > { %1704 = vmatprep.mubr.msk.bf16.mxu0 %vm343_vm0, %v1835_v8  ;;  %1749 = vmatpush3.bf16.msra.mxu0 %v1849_v20 }
  0x49   : > { %1721 = vmatpush3.bf16.msra.mxu1 %v1843_v12  ;;  %1750 = vmatprep.subr.bf16.mxu0 %v1850_v21 }
  0x4a   : > { %1722 = vmatprep.subr.bf16.mxu1 %v1844_v15 }
  0x4c   : > { %1751 = vmatpush3.bf16.msra.mxu0 %v1850_v21 }
  0x4d   : > { %1723 = vmatpush3.bf16.msra.mxu1 %v1844_v15  ;;  %1752 = vmatprep.subr.bf16.mxu0 %v1851_v22 }
  0x4e   : > { %1724 = vmatprep.subr.bf16.mxu1 %v1845_v16 }
  0x4f   : > { %1705 = vmatmul.mubr.msk.bf16.gmra.mrb[8].mxu0 %vm343_vm0, %v1836_v11 }
  0x50   : > { %1708 = vmatprep.mubr.msk.bf16.mxu0 %vm343_vm0, %v1837_v13  ;;  %1753 = vmatpush3.bf16.msra.mxu0 %v1851_v22 }
  0x51   : > { %1725 = vmatpush3.bf16.msra.mxu1 %v1845_v16 }
  0x52   : > { %1726 = vmatprep.subr.bf16.mxu1 %v1846_v17 }
  0x55   : > { %1727 = vmatpush3.bf16.msra.mxu1 %v1846_v17 }
  0x57   : > { %1709 = vmatmul.mubr.msk.bf16.gmra.mrb[12].mxu0 %vm343_vm0, %v1838_v14 }
 0x112   : > { %v1698_v24 = vpop.f32.mrb[0].mxu0 }
 0x113   : > { %v411_v25 = vadd.f32 %v1698_v24, %v2300_v23  ;;  %v402_v26 = vpop.f32.mrb[1].mxu0 }
 0x114   : > { %v403_v27 = vadd.f32 %v2300_v23, %v402_v26  ;;  %v1699_v28 = vpop.f32.mrb[2].mxu0 }
 0x115   : > { %v467_v29 = vmul.f32 0.01, %v411_v25  ;;  %v414_v30 = vadd.f32 %v1699_v28, %v2300_v23  ;;  %v405_v31 = vpop.f32.mrb[3].mxu0 }
 0x116   : > { %v465_v32 = vmul.f32 0.01, %v403_v27  ;;  %v406_v33 = vadd.f32 %v2300_v23, %v405_v31 }
 0x117   : > { %v468_v34 = vmul.f32 0.01, %v414_v30  ;;  %v483_v36 = vmax.f32 %v411_v25, %v467_v29 }
 0x118   : > { %v466_v35 = vmul.f32 0.01, %v406_v33  ;;  %v481_v39 = vmax.f32 %v403_v27, %v465_v32 }
 0x119   : > { %v484_v37 = vmax.f32 %v414_v30, %v468_v34  ;;  %v1854_v34 = vld [vmem:[%s2981_s3 + $0x38] sm:$0xff]  }
 0x11a   : > { %v1702_v38 = vpop.f32.mrb[4].mxu0  ;;  %v482_v40 = vmax.f32 %v406_v33, %v466_v35  ;;  %v1852_v33 = vld [vmem:[%s2981_s3 + $0x28] sm:$0xff]   ;;  %v2330_v35 = vld [vmem:[%s2982_s4 + $0x1] ss:$0 sm:$0xff] }
 0x11b   : > { %v427_v41 = vadd.f32 %v1702_v38, %v2300_v23  ;;  %v418_v42 = vpop.f32.mrb[5].mxu0  ;;  %v498_v43 = vpack.c.bf16 %v484_v37, %v483_v36  ;;  %1754 = vmatprep.subr.bf16.mxu0 %v1852_v33 }
 0x11c   : > { %v419_v44 = vadd.f32 %v2300_v23, %v418_v42  ;;  %v1703_v45 = vpop.f32.mrb[6].mxu0  ;;  %v497_v46 = vpack.c.bf16 %v482_v40, %v481_v39  ;;  %1755 = vmatpush3.bf16.msra.mxu0 %v1852_v33 }
 0x11d   : > { %v471_v47 = vmul.f32 0.01, %v427_v41  ;;  %v430_v48 = vadd.f32 %v1703_v45, %v2300_v23  ;;  %v421_v49 = vpop.f32.mrb[7].mxu0 }
 0x11e   : > { %v469_v50 = vmul.f32 0.01, %v419_v44  ;;  %v422_v51 = vadd.f32 %v2300_v23, %v421_v49  ;;  %1728 = vmatprep.mubr.bf16.mxu1 %v497_v46 }
 0x11f   : > { %v472_v52 = vmul.f32 0.01, %v430_v48  ;;  %1729 = vmatmul.mubr.bf16.vlgmr.msra.gmra.mrb[0].mxu1 %v498_v43  ;;  %v487_v54 = vmax.f32 %v427_v41, %v471_v47 }
 0x120   : > { %v470_v53 = vmul.f32 0.01, %v422_v51  ;;  %v485_v56 = vmax.f32 %v419_v44, %v469_v50 }
 0x121   : > { %v488_v55 = vmax.f32 %v430_v48, %v472_v52 }
 0x122   : > { %v486_v57 = vmax.f32 %v422_v51, %v470_v53  ;;  %v1706_v58 = vpop.f32.mrb[8].mxu0 }
 0x123   : > { %v443_v59 = vadd.f32 %v1706_v58, %v2300_v23  ;;  %v434_v60 = vpop.f32.mrb[9].mxu0  ;;  %v500_v61 = vpack.c.bf16 %v488_v55, %v487_v54 }
 0x124   : > { %v435_v62 = vadd.f32 %v2300_v23, %v434_v60  ;;  %v1707_v63 = vpop.f32.mrb[10].mxu0  ;;  %v499_v0 = vpack.c.bf16 %v486_v57, %v485_v56 }
 0x125   : > { %v475_v1 = vmul.f32 0.01, %v443_v59  ;;  %v446_v2 = vadd.f32 %v1707_v63, %v2300_v23  ;;  %v437_v3 = vpop.f32.mrb[11].mxu0 }
 0x126   : > { %v473_v4 = vmul.f32 0.01, %v435_v62  ;;  %v438_v5 = vadd.f32 %v2300_v23, %v437_v3  ;;  %1732 = vmatprep.mubr.bf16.mxu1 %v499_v0 }
 0x127   : > { %v476_v6 = vmul.f32 0.01, %v446_v2  ;;  %1733 = vmatmul.mubr.bf16.gmra.mrb[4].mxu1 %v500_v61  ;;  %v491_v8 = vmax.f32 %v443_v59, %v475_v1 }
 0x128   : > { %v474_v7 = vmul.f32 0.01, %v438_v5  ;;  %v489_v10 = vmax.f32 %v435_v62, %v473_v4 }
 0x129   : > { %v492_v9 = vmax.f32 %v446_v2, %v476_v6 }
 0x12a   : > { %v490_v11 = vmax.f32 %v438_v5, %v474_v7  ;;  %v1710_v12 = vpop.f32.mrb[12].mxu0 }
 0x12b   : > { %v459_v13 = vadd.f32 %v1710_v12, %v2300_v23  ;;  %v450_v14 = vpop.f32.mrb[13].mxu0  ;;  %v502_v15 = vpack.c.bf16 %v492_v9, %v491_v8 }
 0x12c   : > { %v451_v16 = vadd.f32 %v2300_v23, %v450_v14  ;;  %v1711_v17 = vpop.f32.mrb[14].mxu0  ;;  %v501_v18 = vpack.c.bf16 %v490_v11, %v489_v10 }
 0x12d   : > { %v479_v19 = vmul.f32 0.01, %v459_v13  ;;  %v462_v20 = vadd.f32 %v1711_v17, %v2300_v23  ;;  %v453_v21 = vpop.f32.mrb[15].mxu0 }
 0x12e   : > { %v477_v22 = vmul.f32 0.01, %v451_v16  ;;  %v454_v24 = vadd.f32 %v2300_v23, %v453_v21  ;;  %1736 = vmatprep.mubr.bf16.mxu1 %v501_v18  ;;  %v1853_v23 = vld [vmem:[%s2981_s3 + $0x30] sm:$0xff]  }
 0x12f   : > { %v480_v25 = vmul.f32 0.01, %v462_v20  ;;  %1737 = vmatmul.mubr.bf16.gmra.mrb[8].mxu1 %v502_v15  ;;  %v495_v27 = vmax.f32 %v459_v13, %v479_v19  ;;  %1756 = vmatprep.subr.bf16.mxu0 %v1853_v23 }
 0x130   : > { %v478_v26 = vmul.f32 0.01, %v454_v24  ;;  %v493_v29 = vmax.f32 %v451_v16, %v477_v22  ;;  %1757 = vmatpush3.bf16.msra.mxu0 %v1853_v23 }
 0x131   : > { %v496_v28 = vmax.f32 %v462_v20, %v480_v25  ;;  %1758 = vmatprep.subr.bf16.mxu0 %v1854_v34 }
 0x132   : > { %v494_v30 = vmax.f32 %v454_v24, %v478_v26 }
 0x133   : > { %v504_v31 = vpack.c.bf16 %v496_v28, %v495_v27 }
 0x134   : > { %v503_v32 = vpack.c.bf16 %v494_v30, %v493_v29  ;;  %1759 = vmatpush3.bf16.msra.mxu0 %v1854_v34 }
 0x136   : > { %1740 = vmatprep.mubr.bf16.mxu1 %v503_v32 }
 0x137   : > { %1741 = vmatmul.mubr.bf16.gmra.mrb[12].mxu1 %v504_v31 }
 0x1f2   : > { %v1730_v36 = vpop.f32.mrb[0].mxu1 }
 0x1f3   : > { %v617_v37 = vadd.f32 %v1730_v36, %v2330_v35  ;;  %v608_v38 = vpop.f32.mrb[1].mxu1 }
 0x1f4   : > { %v609_v39 = vadd.f32 %v2330_v35, %v608_v38  ;;  %v1731_v40 = vpop.f32.mrb[2].mxu1 }
 0x1f5   : > { %v673_v41 = vmul.f32 0.01, %v617_v37  ;;  %v620_v42 = vadd.f32 %v1731_v40, %v2330_v35  ;;  %v611_v43 = vpop.f32.mrb[3].mxu1 }
 0x1f6   : > { %v671_v44 = vmul.f32 0.01, %v609_v39  ;;  %v612_v45 = vadd.f32 %v2330_v35, %v611_v43 }
 0x1f7   : > { %v674_v46 = vmul.f32 0.01, %v620_v42  ;;  %v689_v48 = vmax.f32 %v617_v37, %v673_v41 }
 0x1f8   : > { %v672_v47 = vmul.f32 0.01, %v612_v45  ;;  %v687_v50 = vmax.f32 %v609_v39, %v671_v44 }
 0x1f9   : > { %v690_v49 = vmax.f32 %v620_v42, %v674_v46 }
 0x1fa   : > { %v688_v51 = vmax.f32 %v612_v45, %v672_v47  ;;  %v1734_v52 = vpop.f32.mrb[4].mxu1  ;;  %v2352_v45 = vld [vmem:[%s2982_s4 + $0x2] ss:$0 sm:$0xff] }
 0x1fb   : > { %v704_v53 = vpack.c.bf16 %v690_v49, %v689_v48  ;;  %v633_v54 = vadd.f32 %v1734_v52, %v2330_v35  ;;  %v624_v55 = vpop.f32.mrb[5].mxu1 }
 0x1fc   : > { %v625_v56 = vadd.f32 %v2330_v35, %v624_v55  ;;  %v1735_v57 = vpop.f32.mrb[6].mxu1  ;;  %v703_v58 = vpack.c.bf16 %v688_v51, %v687_v50 }
 0x1fd   : > { %v677_v59 = vmul.f32 0.01, %v633_v54  ;;  %v636_v60 = vadd.f32 %v1735_v57, %v2330_v35  ;;  %v627_v61 = vpop.f32.mrb[7].mxu1 }
 0x1fe   : > { %v675_v62 = vmul.f32 0.01, %v625_v56  ;;  %v628_v63 = vadd.f32 %v2330_v35, %v627_v61  ;;  %1760 = vmatprep.mubr.bf16.mxu0 %v703_v58 }
 0x1ff   : > { %v678_v0 = vmul.f32 0.01, %v636_v60  ;;  %1761 = vmatmul.mubr.bf16.vlgmr.msra.gmra.mrb[16].mxu0 %v704_v53  ;;  %v693_v2 = vmax.f32 %v633_v54, %v677_v59 }
 0x200   : > { %v676_v1 = vmul.f32 0.01, %v628_v63  ;;  %v691_v4 = vmax.f32 %v625_v56, %v675_v62 }
 0x201   : > { %v694_v3 = vmax.f32 %v636_v60, %v678_v0 }
 0x202   : > { %v692_v5 = vmax.f32 %v628_v63, %v676_v1  ;;  %v1738_v6 = vpop.f32.mrb[8].mxu1 }
 0x203   : > { %v649_v7 = vadd.f32 %v1738_v6, %v2330_v35  ;;  %v640_v8 = vpop.f32.mrb[9].mxu1  ;;  %v706_v9 = vpack.c.bf16 %v694_v3, %v693_v2 }
 0x204   : > { %v641_v10 = vadd.f32 %v2330_v35, %v640_v8  ;;  %v1739_v11 = vpop.f32.mrb[10].mxu1  ;;  %v705_v12 = vpack.c.bf16 %v692_v5, %v691_v4 }
 0x205   : > { %v681_v13 = vmul.f32 0.01, %v649_v7  ;;  %v652_v14 = vadd.f32 %v1739_v11, %v2330_v35  ;;  %v643_v15 = vpop.f32.mrb[11].mxu1 }
 0x206   : > { %v679_v16 = vmul.f32 0.01, %v641_v10  ;;  %v644_v17 = vadd.f32 %v2330_v35, %v643_v15  ;;  %1764 = vmatprep.mubr.bf16.mxu0 %v705_v12 }
 0x207   : > { %v682_v18 = vmul.f32 0.01, %v652_v14  ;;  %1765 = vmatmul.mubr.bf16.gmra.mrb[20].mxu0 %v706_v9  ;;  %v697_v20 = vmax.f32 %v649_v7, %v681_v13 }
 0x208   : > { %v680_v19 = vmul.f32 0.01, %v644_v17  ;;  %v695_v22 = vmax.f32 %v641_v10, %v679_v16 }
 0x209   : > { %v698_v21 = vmax.f32 %v652_v14, %v682_v18 }
 0x20a   : > { %v696_v24 = vmax.f32 %v644_v17, %v680_v19  ;;  %v1742_v25 = vpop.f32.mrb[12].mxu1 }
 0x20b   : > { %v665_v26 = vadd.f32 %v1742_v25, %v2330_v35  ;;  %v656_v27 = vpop.f32.mrb[13].mxu1  ;;  %v708_v28 = vpack.c.bf16 %v698_v21, %v697_v20 }
 0x20c   : > { %v657_v29 = vadd.f32 %v2330_v35, %v656_v27  ;;  %v1743_v30 = vpop.f32.mrb[14].mxu1  ;;  %v707_v31 = vpack.c.bf16 %v696_v24, %v695_v22  ;;  %v1463_v22 = vlaneseq }
 0x20d   : > { %v685_v32 = vmul.f32 0.01, %v665_v26  ;;  %v668_v33 = vadd.f32 %v1743_v30, %v2330_v35  ;;  %v659_v23 = vpop.f32.mrb[15].mxu1 }
 0x20e   : > { %v683_v34 = vmul.f32 0.01, %v657_v29  ;;  %v660_v36 = vadd.f32 %v2330_v35, %v659_v23  ;;  %1768 = vmatprep.mubr.bf16.mxu0 %v707_v31  ;;  %v2357_v35 = vld [vmem:[%s2982_s4 + $0x3] ss:$0 sm:$0xff] }
 0x20f   : > { %v686_v37 = vmul.f32 0.01, %v668_v33  ;;  %1769 = vmatmul.mubr.bf16.gmra.mrb[24].mxu0 %v708_v28  ;;  %v701_v39 = vmax.f32 %v665_v26, %v685_v32 }
 0x210   : > { %v684_v38 = vmul.f32 0.01, %v660_v36  ;;  %v699_v41 = vmax.f32 %v657_v29, %v683_v34 }
 0x211   : > { %v702_v40 = vmax.f32 %v668_v33, %v686_v37  ;;  %v2432_v37 = vand.u32 127, %v1463_v22 }
 0x212   : > { %v700_v42 = vmax.f32 %v660_v36, %v684_v38 }
 0x213   : > { %v710_v43 = vpack.c.bf16 %v702_v40, %v701_v39  ;;  %vm1465_vm0 = vcmp.lt.s32.totalorder %v2432_v37, 8 }
 0x214   : > { %v709_v44 = vpack.c.bf16 %v700_v42, %v699_v41 }
 0x216   : > { %1772 = vmatprep.mubr.bf16.mxu0 %v709_v44 }
 0x217   : > { %1773 = vmatmul.mubr.bf16.gmra.mrb[28].mxu0 %v710_v43 }
 0x2d2   : > { %v1762_v46 = vpop.f32.mrb[16].mxu0 }
 0x2d3   : > { %v2360_v47 = vadd.f32 %v1762_v46, %v2352_v45  ;;  %v816_v48 = vpop.f32.mrb[17].mxu0 }
 0x2d4   : > { %v2363_v49 = vadd.f32 %v2352_v45, %v816_v48  ;;  %v1763_v50 = vpop.f32.mrb[18].mxu0 }
 0x2d5   : > { %v2367_v51 = vsub.f32 %v2357_v35, %v2360_v47  ;;  %v2370_v52 = vadd.f32 %v1763_v50, %v2352_v45  ;;  %v819_v53 = vpop.f32.mrb[19].mxu0 }
 0x2d6   : > { %v2374_v54 = vsub.f32 %v2357_v35, %v2363_v49  ;;  %v2377_v55 = vadd.f32 %v2352_v45, %v819_v53 }
 0x2d7   : > { %v917_v56 = vand.u32 2147483647, %v2367_v51  ;;  %v2382_v57 = vsub.f32 %v2357_v35, %v2370_v52 }
 0x2d8   : > { %v915_v58 = vand.u32 2147483647, %v2374_v54  ;;  %v2387_v59 = vsub.f32 %v2357_v35, %v2377_v55 }
 0x2d9   : > { %v933_v60 = vsub.f32 0.0, %v917_v56  ;;  %v918_v61 = vand.u32 2147483647, %v2382_v57 }
 0x2da   : > { %v931_v62 = vsub.f32 0.0, %v915_v58  ;;  %v916_v63 = vand.u32 2147483647, %v2387_v59  ;;  %v1766_v0 = vpop.f32.mrb[20].mxu0 }
 0x2db   : > { %v951_v1 = vmul.f32 1.442695, %v933_v60  ;;  %v934_v2 = vsub.f32 0.0, %v918_v61  ;;  %v2392_v3 = vadd.f32 %v1766_v0, %v2352_v45  ;;  %v832_v4 = vpop.f32.mrb[21].mxu0 }
 0x2dc   : > { %v947_v5 = vmul.f32 1.442695, %v931_v62  ;;  %v932_v6 = vsub.f32 0.0, %v916_v63  ;;  %v2395_v7 = vadd.f32 %v2352_v45, %v832_v4  ;;  %v1767_v8 = vpop.f32.mrb[22].mxu0 }
 0x2dd   : > { %1855 = vpow2.f32 %v951_v1  ;;  %v953_v9 = vmul.f32 1.442695, %v934_v2  ;;  %v2399_v10 = vsub.f32 %v2357_v35, %v2392_v3  ;;  %v2402_v11 = vadd.f32 %v1767_v8, %v2352_v45  ;;  %v835_v12 = vpop.f32.mrb[23].mxu0 }
 0x2de   : > { %1857 = vpow2.f32 %v947_v5  ;;  %v949_v13 = vmul.f32 1.442695, %v932_v6  ;;  %v2406_v14 = vsub.f32 %v2357_v35, %v2395_v7  ;;  %v2409_v15 = vadd.f32 %v2352_v45, %v835_v12 }
 0x2df   : > { %1859 = vpow2.f32 %v953_v9  ;;  %v921_v16 = vand.u32 2147483647, %v2399_v10  ;;  %v2414_v17 = vsub.f32 %v2357_v35, %v2402_v11 }
 0x2e0   : > { %1861 = vpow2.f32 %v949_v13  ;;  %v919_v18 = vand.u32 2147483647, %v2406_v14  ;;  %v2419_v19 = vsub.f32 %v2357_v35, %v2409_v15 }
 0x2e1   : > { %v937_v20 = vsub.f32 0.0, %v921_v16  ;;  %v922_v21 = vand.u32 2147483647, %v2414_v17 }
 0x2e2   : > { %v935_v24 = vsub.f32 0.0, %v919_v18  ;;  %v920_v25 = vand.u32 2147483647, %v2419_v19  ;;  %v1770_v26 = vpop.f32.mrb[24].mxu0 }
 0x2e3   : > { %v959_v27 = vmul.f32 1.442695, %v937_v20  ;;  %v938_v28 = vsub.f32 0.0, %v922_v21  ;;  %v2424_v29 = vadd.f32 %v1770_v26, %v2352_v45  ;;  %v848_v30 = vpop.f32.mrb[25].mxu0 }
 0x2e4   : > { %v955_v31 = vmul.f32 1.442695, %v935_v24  ;;  %v936_v32 = vsub.f32 0.0, %v920_v25  ;;  %v1771_v33 = vpop.f32.mrb[26].mxu0  ;;  %v2444_v5 = vadd.f32 %v2352_v45, %v848_v30  ;;  %v3007_v24 = vmax.f32 %v2374_v54, 0.0 }
 0x2e5   : > { %1863 = vpow2.f32 %v959_v27  ;;  %v961_v23 = vmul.f32 1.442695, %v938_v28  ;;  %v2428_v34 = vsub.f32 %v2357_v35, %v2424_v29  ;;  %v2430_v36 = vpop.f32.mrb[27].mxu0  ;;  %v2453_v21 = vadd.f32 %v1771_v33, %v2352_v45 }
 0x2e6   : > { %1865 = vpow2.f32 %v955_v31  ;;  %v957_v38 = vmul.f32 1.442695, %v936_v32  ;;  %v2467_v32 = vsub.f32 %v2357_v35, %v2444_v5 }
 0x2e7   : > { %v1856_v39 = vpop.eup %1855  ;;  %1867 = vpow2.f32 %v961_v23  ;;  %v925_v42 = vand.u32 2147483647, %v2428_v34 }
 0x2e8   : > { %v1858_v43 = vpop.eup %1857  ;;  %v997_v44 = vadd.f32 1.0, %v1856_v39  ;;  %v1000_v46 = vmul.f32 -0.5, %v1856_v39  ;;  %1869 = vpow2.f32 %v957_v38  ;;  %v1003_v62 = vand.u32 2147483647, %v1856_v39 }
 0x2e9   : > { %v1860_v50 = vpop.eup %1859  ;;  %v979_v53 = vadd.f32 1.0, %v1858_v43  ;;  %v982_v56 = vmul.f32 -0.5, %v1858_v43  ;;  %v941_v0 = vsub.f32 0.0, %v925_v42  ;;  %v985_v2 = vand.u32 2147483647, %v1858_v43 }
 0x2ea   : > { %v1862_v61 = vpop.eup %1861  ;;  %1871 = vlog2.f32 %v997_v44  ;;  %v1006_v63 = vadd.f32 1.0, %v1860_v50  ;;  %v2440_v1 = vpop.f32.mrb[28].mxu0  ;;  %v1001_v8 = vadd.f32 1.0, %v1000_v46  ;;  %v1009_v18 = vmul.f32 -0.5, %v1860_v50 }
 0x2eb   : > { %1873 = vlog2.f32 %v979_v53  ;;  %v2446_v6 = vpop.f32.mrb[29].mxu0  ;;  %v988_v9 = vadd.f32 1.0, %v1862_v61  ;;  %v983_v16 = vadd.f32 1.0, %v982_v56  ;;  %vm2457_vm1 = vcmp.lt.f32.partialorder %v1003_v62, 0.0004427343 }
 0x2ec   : > { %1875 = vlog2.f32 %v1006_v63  ;;  %v2449_v13 = vpop.f32.mrb[30].mxu0  ;;  %v991_v25 = vmul.f32 -0.5, %v1862_v61  ;;  %v967_v26 = vmul.f32 1.442695, %v941_v0  ;;  %vm2461_vm2 = vcmp.lt.f32.partialorder %v985_v2, 0.0004427343 }
 0x2ed   : > { %v2455_v22 = vpop.f32.mrb[31].mxu0  ;;  %1877 = vlog2.f32 %v988_v9  ;;  %v1012_v30 = vand.u32 2147483647, %v1860_v50  ;;  %v994_v31 = vand.u32 2147483647, %v1862_v61  ;;  %v1002_v23 = vmul.f32 %v1856_v39, %v1001_v8 }
 0x2ee   : > { %1879 = vpow2.f32 %v967_v26  ;;  %v984_v46 = vmul.f32 %v1858_v43, %v983_v16  ;;  %v1010_v53 = vadd.f32 1.0, %v1009_v18  ;;  %v992_v0 = vadd.f32 1.0, %v991_v25 }
 0x2ef   : > { %v1864_v27 = vpop.eup %1863  ;;  %vm2471_vm3 = vcmp.lt.f32.partialorder %v1012_v30, 0.0004427343  ;;  %vm2475_vm4 = vcmp.lt.f32.partialorder %v994_v31, 0.0004427343  ;;  %v923_v30 = vand.u32 2147483647, %v2467_v32 }
 0x2f0   : > { %v1866_v33 = vpop.eup %1865  ;;  %v1033_v38 = vadd.f32 1.0, %v1864_v27  ;;  %v1036_v42 = vmul.f32 -0.5, %v1864_v27  ;;  %v1039_v2 = vand.u32 2147483647, %v1864_v27  ;;  %v1011_v12 = vmul.f32 %v1860_v50, %v1010_v53 }
 0x2f1   : > { %v1868_v44 = vpop.eup %1867  ;;  %v1015_v56 = vadd.f32 1.0, %v1866_v33  ;;  %v1018_v62 = vmul.f32 -0.5, %v1866_v33  ;;  %v1021_v16 = vand.u32 2147483647, %v1866_v33  ;;  %v993_v31 = vmul.f32 %v1862_v61, %v992_v0 }
 0x2f2   : > { %v2469_v63 = vpop.eup %1869  ;;  %1881 = vlog2.f32 %v1033_v38  ;;  %v1042_v9 = vadd.f32 1.0, %v1868_v44  ;;  %v1037_v8 = vadd.f32 1.0, %v1036_v42  ;;  %v1045_v18 = vmul.f32 -0.5, %v1868_v44 }
 0x2f3   : > { %1883 = vlog2.f32 %v1015_v56  ;;  %v1024_v26 = vadd.f32 1.0, %v2469_v63  ;;  %v1019_v4 = vadd.f32 1.0, %v1018_v62  ;;  %vm2481_vm5 = vcmp.lt.f32.partialorder %v1039_v2, 0.0004427343 }
 0x2f4   : > { %v1872_v43 = vpop.eup %1871  ;;  %1885 = vlog2.f32 %v1042_v9  ;;  %v1048_v42 = vand.u32 2147483647, %v1868_v44  ;;  %v1038_v41 = vmul.f32 %v1864_v27, %v1037_v8  ;;  %v1027_v40 = vmul.f32 -0.5, %v2469_v63 }
 0x2f5   : > { %v1874_v25 = vpop.eup %1873  ;;  %v999_v38 = vmul.f32 0.6931472, %v1872_v43  ;;  %v3004_v50 = vmax.f32 %v2367_v51, 0.0  ;;  %vm2492_vm6 = vcmp.lt.f32.partialorder %v1021_v16, 0.0004427343  ;;  %v1046_v0 = vadd.f32 1.0, %v1045_v18 }
 0x2f6   : > { %v1876_v60 = vpop.eup %1875  ;;  %v981_v58 = vmul.f32 0.6931472, %v1874_v25  ;;  %1887 = vlog2.f32 %v1024_v26  ;;  %v1020_v28 = vmul.f32 %v1866_v33, %v1019_v4  ;;  %v3008_v2 = vmax.f32 %v2382_v57, 0.0 }
 0x2f7   : > { %v1005_v56 = vsel %vm2457_vm1, %v1002_v23, %v999_v38  ;;  %v1008_v9 = vmul.f32 0.6931472, %v1876_v60  ;;  %v1878_v43 = vpop.eup %1877  ;;  %v2499_v60 = vld [vmem:[%s2982_s4 + $0x4] ss:$0 sm:$0xff]  ;;  %vm2510_vm7 = vcmp.lt.f32.partialorder %v1048_v42, 0.0004427343  ;;  %v1047_v42 = vmul.f32 %v1868_v44, %v1046_v0 }
 0x2f8   : > { %v1125_v53 = vadd.f32 %v1005_v56, %v3004_v50  ;;  %v987_v62 = vsel %vm2461_vm2, %v984_v46, %v981_v58  ;;  %v990_v23 = vmul.f32 0.6931472, %v1878_v43  ;;  %v2505_v58 = vpop.eup %1879  ;;  %v1030_v18 = vand.u32 2147483647, %v2469_v63 }
 0x2f9   : > { %v1123_v27 = vadd.f32 %v987_v62, %v3007_v24  ;;  %v1014_v51 = vsel %vm2471_vm3, %v1011_v12, %v1008_v9  ;;  %v1028_v20 = vadd.f32 1.0, %v1027_v40  ;;  %v1069_v4 = vadd.f32 1.0, %v2505_v58 }
 0x2fa   : > { %v1141_v46 = vsub.f32 %v2357_v35, %v1125_v53  ;;  %v1126_v8 = vadd.f32 %v1014_v51, %v3008_v2  ;;  %v996_v12 = vsel %vm2475_vm4, %v993_v31, %v990_v23  ;;  %v3011_v25 = vmax.f32 %v2387_v59, 0.0 }
 0x2fb   : > { %v1139_v54 = vsub.f32 %v2357_v35, %v1123_v27  ;;  %1889 = vlog2.f32 %v1069_v4  ;;  %v939_v39 = vsub.f32 0.0, %v923_v30  ;;  %vm2533_vm8 = vcmp.lt.f32.partialorder %v1030_v18, 0.0004427343 }
 0x2fc   : > { %v1882_v33 = vpop.eup %1881  ;;  %v2520_v26 = vsub.f32 %v1141_v46, %v2499_v60  ;;  %v1142_v57 = vsub.f32 %v2357_v35, %v1126_v8  ;;  %v1124_v38 = vadd.f32 %v996_v12, %v3011_v25  ;;  %v1072_v59 = vmul.f32 -0.5, %v2505_v58 }
 0x2fd   : > { %v1884_v56 = vpop.eup %1883  ;;  %v2526_v9 = vsub.f32 %v1139_v54, %v2499_v60  ;;  %v1035_v43 = vmul.f32 0.6931472, %v1882_v33  ;;  %v1029_v24 = vmul.f32 %v2469_v63, %v1028_v20  ;;  %v1075_v46 = vand.u32 2147483647, %v2505_v58 }
 0x2fe   : > { %v1886_v40 = vpop.eup %1885  ;;  %v1193_v31 = vand.u32 2147483647, %v2520_v26  ;;  %v2530_v50 = vsub.f32 %v1142_v57, %v2499_v60  ;;  %v1140_v53 = vsub.f32 %v2357_v35, %v1124_v38  ;;  %v1017_v30 = vmul.f32 0.6931472, %v1884_v56 }
 0x2ff   : > { %v1191_v44 = vand.u32 2147483647, %v2526_v9  ;;  %v1041_v0 = vsel %vm2481_vm5, %v1038_v41, %v1035_v43  ;;  %v3014_v8 = vmax.f32 %v2399_v10, 0.0  ;;  %v1044_v48 = vmul.f32 0.6931472, %v1886_v40 }
 0x300   : > { %v1209_v27 = vsub.f32 0.0, %v1193_v31  ;;  %v1194_v51 = vand.u32 2147483647, %v2530_v50  ;;  %v2544_v23 = vsub.f32 %v1140_v53, %v2499_v60  ;;  %v1023_v54 = vsel %vm2492_vm6, %v1020_v28, %v1017_v30  ;;  %v1888_v41 = vpop.eup %1887 }
 0x301   : > { %v1207_v2 = vsub.f32 0.0, %v1191_v44  ;;  %v1129_v18 = vadd.f32 %v1041_v0, %v3014_v8  ;;  %v1073_v20 = vadd.f32 1.0, %v1072_v59  ;;  %v3015_v25 = vmax.f32 %v2406_v14, 0.0 }
 0x302   : > { %v1227_v12 = vmul.f32 1.442695, %v1209_v27  ;;  %v1210_v4 = vsub.f32 0.0, %v1194_v51  ;;  %v1192_v63 = vand.u32 2147483647, %v2544_v23  ;;  %v1050_v10 = vsel %vm2510_vm7, %v1047_v42, %v1044_v48 }
 0x303   : > { %v1223_v33 = vmul.f32 1.442695, %v1207_v2  ;;  %v1145_v57 = vsub.f32 %v2357_v35, %v1129_v18  ;;  %v1127_v38 = vadd.f32 %v1023_v54, %v3015_v25  ;;  %v3016_v28 = vmax.f32 %v2414_v17, 0.0 }
 0x304   : > { %1891 = vpow2.f32 %v1227_v12  ;;  %v1229_v56 = vmul.f32 1.442695, %v1210_v4  ;;  %v1208_v61 = vsub.f32 0.0, %v1192_v63  ;;  %v1026_v53 = vmul.f32 0.6931472, %v1888_v41 }
 0x305   : > { %v1130_v43 = vadd.f32 %v1050_v10, %v3016_v28  ;;  %1893 = vpow2.f32 %v1223_v33  ;;  %v2560_v40 = vsub.f32 %v1145_v57, %v2499_v60  ;;  %v1143_v31 = vsub.f32 %v2357_v35, %v1127_v38  ;;  %v1890_v16 = vpop.eup %1889 }
 0x306   : > { %1895 = vpow2.f32 %v1229_v56  ;;  %v1225_v59 = vmul.f32 1.442695, %v1208_v61  ;;  %v963_v44 = vmul.f32 1.442695, %v939_v39  ;;  %v1032_v17 = vsel %vm2533_vm8, %v1029_v24, %v1026_v53 }
 0x307   : > { %v1146_v14 = vsub.f32 %v2357_v35, %v1130_v43  ;;  %v1197_v42 = vand.u32 2147483647, %v2560_v40  ;;  %v2566_v0 = vsub.f32 %v1143_v31, %v2499_v60  ;;  %v1074_v30 = vmul.f32 %v2505_v58, %v1073_v20 }
 0x308   : > { %1897 = vpow2.f32 %v1225_v59  ;;  %v3017_v51 = vmax.f32 %v2419_v19, 0.0  ;;  %v1071_v8 = vmul.f32 0.6931472, %v1890_v16  ;;  %vm2577_vm9 = vcmp.lt.f32.partialorder %v1075_v46, 0.0004427343 }
 0x309   : > { %v2572_v27 = vsub.f32 %v1146_v14, %v2499_v60  ;;  %v1213_v39 = vsub.f32 0.0, %v1197_v42  ;;  %v1195_v18 = vand.u32 2147483647, %v2566_v0  ;;  %v2583_v62 = vadd.f32 %v2352_v45, %v2430_v36 }
 0x30a   : > { %v1128_v2 = vadd.f32 %v1032_v17, %v3017_v51  ;;  %v909_v48 = vmax.f32 %v2428_v34, 0.0  ;;  %v1077_v19 = vsel %vm2577_vm9, %v1074_v30, %v1071_v8  ;;  %1899 = vpow2.f32 %v963_v44 }
 0x30b   : > { %3020 = vst [vmem:[#allocation8_spill] sm:$0xff] %v2583_v62  ;;  %v1198_v58 = vand.u32 2147483647, %v2572_v27  ;;  %v1235_v41 = vmul.f32 1.442695, %v1213_v39  ;;  %v1211_v12 = vsub.f32 0.0, %v1195_v18  ;;  %v2592_v46 = vsub.f32 %v2357_v35, %v2453_v21 }
 0x30c   : > { %v1144_v24 = vsub.f32 %v2357_v35, %v1128_v2  ;;  %v1133_v57 = vadd.f32 %v1077_v19, %v909_v48 }
 0x30d   : > { %v1214_v63 = vsub.f32 0.0, %v1198_v58  ;;  %1901 = vpow2.f32 %v1235_v41  ;;  %v1231_v33 = vmul.f32 1.442695, %v1211_v12  ;;  %v926_v53 = vand.u32 2147483647, %v2592_v46 }
 0x30e   : > { %v2598_v34 = vsub.f32 %v1144_v24, %v2499_v60  ;;  %v1892_v25 = vpop.eup %1891  ;;  %v1149_v30 = vsub.f32 %v2357_v35, %v1133_v57  ;;  %v2610_v58 = vsub.f32 %v2357_v35, %v2583_v62 }
 0x30f   : > { %v1237_v61 = vmul.f32 1.442695, %v1214_v63  ;;  %v1894_v28 = vpop.eup %1893  ;;  %v1273_v43 = vadd.f32 1.0, %v1892_v25  ;;  %1903 = vpow2.f32 %v1231_v33  ;;  %v1276_v14 = vmul.f32 -0.5, %v1892_v25 }
 0x310   : > { %v1896_v59 = vpop.eup %1895  ;;  %v1255_v44 = vadd.f32 1.0, %v1894_v28  ;;  %v1258_v16 = vmul.f32 -0.5, %v1894_v28  ;;  %v1196_v17 = vand.u32 2147483647, %v2598_v34  ;;  %v1279_v2 = vand.u32 2147483647, %v1892_v25 }
 0x311   : > { %1905 = vpow2.f32 %v1237_v61  ;;  %v1282_v42 = vadd.f32 1.0, %v1896_v59  ;;  %v1261_v8 = vand.u32 2147483647, %v1894_v28  ;;  %v1285_v39 = vmul.f32 -0.5, %v1896_v59 }
 0x312   : > { %1907 = vlog2.f32 %v1273_v43  ;;  %v1898_v51 = vpop.eup %1897  ;;  %v1277_v24 = vadd.f32 1.0, %v1276_v14  ;;  %v1259_v48 = vadd.f32 1.0, %v1258_v16  ;;  %v1288_v63 = vand.u32 2147483647, %v1896_v59 }
 0x313   : > { %1909 = vlog2.f32 %v1255_v44  ;;  %v1264_v18 = vadd.f32 1.0, %v1898_v51  ;;  %v1267_v19 = vmul.f32 -0.5, %v1898_v51  ;;  %v1212_v33 = vsub.f32 0.0, %v1196_v17 }
 0x314   : > { %1911 = vlog2.f32 %v1282_v42  ;;  %v2613_v12 = vpop.eup %1899  ;;  %v2616_v57 = vsub.f32 %v1149_v30, %v2499_v60  ;;  %vm2618_vm10 = vcmp.lt.f32.partialorder %v1279_v2, 0.0004427343  ;;  %vm2622_vm11 = vcmp.lt.f32.partialorder %v1261_v8, 0.0004427343 }
 0x315   : > { %1913 = vlog2.f32 %v1264_v18  ;;  %v1286_v14 = vadd.f32 1.0, %v1285_v39  ;;  %v2626_v44 = vsub.f32 0.0, %v926_v53  ;;  %v1270_v42 = vand.u32 2147483647, %v1898_v51 }
 0x316   : > { %v1233_v41 = vmul.f32 1.442695, %v1212_v33  ;;  %v1201_v18 = vand.u32 2147483647, %v2616_v57  ;;  %v2631_v17 = vadd.f32 %v2440_v1, %v2352_v45  ;;  %v1278_v30 = vmul.f32 %v1892_v25, %v1277_v24 }
 0x317   : > { %v1902_v16 = vpop.eup %1901  ;;  %v1268_v2 = vadd.f32 1.0, %v1267_v19  ;;  %v1054_v8 = vmul.f32 -0.5, %v2613_v12  ;;  %v1260_v31 = vmul.f32 %v1894_v28, %v1259_v48  ;;  %vm2636_vm12 = vcmp.lt.f32.partialorder %v1288_v63, 0.0004427343 }
 0x318   : > { %v1309_v20 = vadd.f32 1.0, %v1902_v16  ;;  %v1312_v39 = vmul.f32 -0.5, %v1902_v16  ;;  %1915 = vpow2.f32 %v1233_v41  ;;  %v1287_v56 = vmul.f32 %v1896_v59, %v1286_v14 }
 0x319   : > { %v2634_v54 = vpop.eup %1903  ;;  %v1315_v1 = vand.u32 2147483647, %v1902_v16  ;;  %vm2643_vm13 = vcmp.lt.f32.partialorder %v1270_v42, 0.0004427343  ;;  %v1217_v48 = vsub.f32 0.0, %v1201_v18  ;;  %v1051_v63 = vadd.f32 1.0, %v2613_v12 }
 0x31a   : > { %1917 = vlog2.f32 %v1309_v20  ;;  %v1291_v25 = vadd.f32 1.0, %v2634_v54  ;;  %v1269_v41 = vmul.f32 %v1898_v51, %v1268_v2  ;;  %v2649_v36 = vadd.f32 1.0, %v1054_v8 }
 0x31b   : > { %v2640_v33 = vpop.eup %1905  ;;  %v1313_v14 = vadd.f32 1.0, %v1312_v39  ;;  %v1057_v42 = vand.u32 2147483647, %v2613_v12  ;;  %vm2654_vm14 = vcmp.lt.f32.partialorder %v1315_v1, 0.0004427343  ;;  %v3031_v2 = vmax.f32 %v2520_v26, 0.0 }
 0x31c   : > { %v1908_v24 = vpop.eup %1907  ;;  %v1318_v28 = vadd.f32 1.0, %v2640_v33  ;;  %1919 = vlog2.f32 %v1291_v25  ;;  %v1297_v39 = vand.u32 2147483647, %v2634_v54  ;;  %v1243_v25 = vmul.f32 1.442695, %v1217_v48 }
 0x31d   : > { %v1910_v10 = vpop.eup %1909  ;;  %v1275_v38 = vmul.f32 0.6931472, %v1908_v24  ;;  %v1294_v24 = vmul.f32 -0.5, %v2634_v54  ;;  %v3032_v61 = vmax.f32 %v2526_v9, 0.0  ;;  %v3033_v26 = vmax.f32 %v2530_v50, 0.0 }
 0x31e   : > { %v1912_v20 = vpop.eup %1911  ;;  %v1257_v59 = vmul.f32 0.6931472, %v1910_v10  ;;  %1921 = vlog2.f32 %v1318_v28  ;;  %v1321_v28 = vmul.f32 -0.5, %v2640_v33  ;;  %v1324_v43 = vand.u32 2147483647, %v2640_v33 }
 0x31f   : > { %v1281_v4 = vsel %vm2618_vm10, %v1278_v30, %v1275_v38  ;;  %v1284_v62 = vmul.f32 0.6931472, %v1912_v20  ;;  %v1914_v51 = vpop.eup %1913  ;;  %1923 = vpow2.f32 %v1243_v25  ;;  %v1295_v48 = vadd.f32 1.0, %v1294_v24 }
 0x320   : > { %v1401_v8 = vadd.f32 %v1281_v4, %v3031_v2  ;;  %v1263_v10 = vsel %vm2622_vm11, %v1260_v31, %v1257_v59  ;;  %v1266_v1 = vmul.f32 0.6931472, %v1914_v51  ;;  %1925 = vlog2.f32 %v1051_v63 }
 0x321   : > { %v1399_v38 = vadd.f32 %v1263_v10, %v3032_v61  ;;  %v1290_v30 = vsel %vm2636_vm12, %v1287_v56, %v1284_v62  ;;  %v3034_v59 = vmax.f32 %v2544_v23, 0.0  ;;  %v1314_v50 = vmul.f32 %v1902_v16, %v1313_v14 }
 0x322   : > { %v1417_v20 = vadd.f32 %v2499_v60, %v1401_v8  ;;  %v1402_v4 = vadd.f32 %v1290_v30, %v3033_v26  ;;  %v1272_v9 = vsel %vm2643_vm13, %v1269_v41, %v1266_v1  ;;  %v2676_v53 = vpop.eup %1915  ;;  %vm2681_vm15 = vcmp.lt.f32.partialorder %v1297_v39, 0.0004427343 }
 0x323   : > { %v1415_v31 = vadd.f32 %v2499_v60, %v1399_v38  ;;  %v1400_v51 = vadd.f32 %v1272_v9, %v3034_v59  ;;  %v1322_v25 = vadd.f32 1.0, %v1321_v28  ;;  %v1300_v19 = vadd.f32 1.0, %v2676_v53 }
 0x324   : > { %v1435_v62 = vmul.f32 1.442695, %v1417_v20  ;;  %v1418_v56 = vadd.f32 %v2499_v60, %v1402_v4  ;;  %v1918_v2 = vpop.eup %1917  ;;  %v1296_v23 = vmul.f32 %v2634_v54, %v1295_v48  ;;  %vm2689_vm1 = vcmp.lt.f32.partialorder %v1324_v43, 0.0004427343 }
 0x325   : > { %v1431_v8 = vmul.f32 1.442695, %v1415_v31  ;;  %v1416_v41 = vadd.f32 %v2499_v60, %v1400_v51  ;;  %v1311_v24 = vmul.f32 0.6931472, %v1918_v2  ;;  %v969_v14 = vmul.f32 1.442695, %v2626_v44 }
 0x326   : > { %1927 = vpow2.f32 %v1435_v62  ;;  %v1437_v63 = vmul.f32 1.442695, %v1418_v56  ;;  %v1920_v61 = vpop.eup %1919  ;;  %v3039_v28 = vmax.f32 %v2560_v40, 0.0  ;;  %v1323_v54 = vmul.f32 %v2640_v33, %v1322_v25 }
 0x327   : > { %1929 = vpow2.f32 %v1431_v8  ;;  %v1433_v38 = vmul.f32 1.442695, %v1416_v41  ;;  %v1317_v30 = vsel %vm2654_vm14, %v1314_v50, %v1311_v24  ;;  %v1293_v1 = vmul.f32 0.6931472, %v1920_v61 }
 0x328   : > { %v1922_v39 = vpop.eup %1921  ;;  %1931 = vpow2.f32 %v1437_v63  ;;  %v1405_v20 = vadd.f32 %v1317_v30, %v3039_v28  ;;  %v924_v44 = vand.u32 2147483647, %v2610_v58  ;;  %v2704_v43 = vsub.f32 %v2357_v35, %v2631_v17 }
 0x329   : > { %v1320_v26 = vmul.f32 0.6931472, %v1922_v39  ;;  %1933 = vlog2.f32 %v1300_v19  ;;  %v1299_v4 = vsel %vm2681_vm15, %v1296_v23, %v1293_v1  ;;  %v3040_v31 = vmax.f32 %v2566_v0, 0.0  ;;  %v2711_v33 = vpop.eup %1923 }
 0x32a   : > { %1935 = vpow2.f32 %v1433_v38  ;;  %v1421_v18 = vadd.f32 %v2499_v60, %v1405_v20  ;;  %v3041_v48 = vmax.f32 %v2572_v27, 0.0  ;;  %v1303_v56 = vmul.f32 -0.5, %v2676_v53  ;;  %v1926_v50 = vpop.eup %1925 }
 0x32b   : > { %v1403_v40 = vadd.f32 %v1299_v4, %v3040_v31  ;;  %v1326_v9 = vsel %vm2689_vm1, %v1323_v54, %v1320_v26  ;;  %1937 = vpow2.f32 %v969_v14  ;;  %v940_v59 = vsub.f32 0.0, %v924_v44 }
 0x32c   : > { %v1406_v62 = vadd.f32 %v1326_v9, %v3041_v48  ;;  %v929_v51 = vand.u32 2147483647, %v2704_v43  ;;  %v1443_v2 = vmul.f32 1.442695, %v1421_v18  ;;  %v1345_v8 = vadd.f32 1.0, %v2711_v33 }
 0x32d   : > { %v1419_v0 = vadd.f32 %v2499_v60, %v1403_v40  ;;  %v1056_v10 = vmul.f32 %v2613_v12, %v2649_v36  ;;  %v1306_v19 = vand.u32 2147483647, %v2676_v53  ;;  %v1053_v27 = vmul.f32 0.6931472, %v1926_v50 }
 0x32e   : > { %v1422_v25 = vadd.f32 %v2499_v60, %v1406_v62  ;;  %vm1058_vm2 = vcmp.lt.f32.partialorder %v1057_v42, 0.0004427343  ;;  %1939 = vpow2.f32 %v1443_v2  ;;  %v965_v41 = vmul.f32 1.442695, %v940_v59 }
 0x32f   : > { %v1439_v63 = vmul.f32 1.442695, %v1419_v0  ;;  %v945_v24 = vsub.f32 0.0, %v929_v51  ;;  %v1304_v16 = vadd.f32 1.0, %v1303_v56  ;;  %1941 = vlog2.f32 %v1345_v8 }
 0x330   : > { %v1928_v61 = vpop.eup %1927  ;;  %v1445_v23 = vmul.f32 1.442695, %v1422_v25  ;;  %v1059_v14 = vsel %vm1058_vm2, %v1056_v10, %v1053_v27  ;;  %v1348_v38 = vmul.f32 -0.5, %v2711_v33  ;;  %v3042_v12 = vmax.f32 %v2467_v32, 0.0 }
 0x331   : > { %v1930_v39 = vpop.eup %1929  ;;  %v1468_v36 = vsel %vm1465_vm0, %v2360_v47, %v1928_v61  ;;  %1943 = vpow2.f32 %v1439_v63  ;;  %v975_v28 = vmul.f32 1.442695, %v945_v24  ;;  %v2741_v47 = vadd.f32 %v2352_v45, %v2446_v6 }
 0x332   : > { %v1131_v42 = vadd.f32 %v1059_v14, %v3042_v12  ;;  %v1932_v30 = vpop.eup %1931  ;;  %1484 = vst [vmem:[%s2733_s30 + $0x10] sm:$0xff] %v1468_v36  ;;  %v1466_v1 = vsel %vm1465_vm0, %v2363_v49, %v1930_v39  ;;  %1945 = vpow2.f32 %v1445_v23  ;;  %v2750_v54 = vadd.f32 %v2449_v13, %v2352_v45 }
 0x333   : > { %v1934_v20 = vpop.eup %1933  ;;  %1482 = vst [vmem:[%s2733_s30] sm:$0xff] %v1466_v1  ;;  %v1469_v32 = vsel %vm1465_vm0, %v2370_v52, %v1932_v30  ;;  %1947 = vpow2.f32 %v965_v41  ;;  %v1305_v6 = vmul.f32 %v2676_v53, %v1304_v16  ;;  %v2756_v44 = vsub.f32 %v2357_v35, %v2741_v47 }
 0x334   : > { %v1147_v26 = vsub.f32 %v2357_v35, %v1131_v42  ;;  %v1936_v49 = vpop.eup %1935  ;;  %1485 = vst [vmem:[%s2733_s30 + $0x18] sm:$0xff] %v1469_v32  ;;  %v1302_v4 = vmul.f32 0.6931472, %v1934_v20  ;;  %1949 = vpow2.f32 %v975_v28  ;;  %vm1307_vm3 = vcmp.lt.f32.partialorder %v1306_v19, 0.0004427343 }
 0x335   : > { %v2758_v18 = vpop.eup %1937  ;;  %v1467_v52 = vsel %vm1465_vm0, %v2377_v55, %v1936_v49  ;;  %v2768_v31 = vsub.f32 %v2357_v35, %v2750_v54  ;;  %v2774_v9 = vadd.f32 %v2352_v45, %v2455_v22  ;;  %v3043_v48 = vmax.f32 %v2598_v34, 0.0 }
 0x336   : > { %v2764_v13 = vsub.f32 %v1147_v26, %v2499_v60  ;;  %1483 = vst [vmem:[%s2733_s30 + $0x8] sm:$0xff] %v1467_v52  ;;  %v1308_v53 = vsel %vm1307_vm3, %v1305_v6, %v1302_v4  ;;  %v1078_v40 = vadd.f32 1.0, %v2758_v18  ;;  %v1349_v55 = vadd.f32 1.0, %v1348_v38 }
 0x337   : > { %v1404_v62 = vadd.f32 %v1308_v53, %v3043_v48  ;;  %v1351_v59 = vand.u32 2147483647, %v2711_v33  ;;  %v927_v51 = vand.u32 2147483647, %v2756_v44  ;;  %v930_v8 = vand.u32 2147483647, %v2768_v31 }
 0x338   : > { %v1199_v56 = vand.u32 2147483647, %v2764_v13  ;;  %1951 = vlog2.f32 %v1078_v40  ;;  %v1940_v50 = vpop.eup %1939  ;;  %v1081_v34 = vmul.f32 -0.5, %v2758_v18  ;;  %v2789_v25 = vsub.f32 %v2357_v35, %v2774_v9 }
 0x339   : > { %v1420_v2 = vadd.f32 %v2499_v60, %v1404_v62  ;;  %v1942_v45 = vpop.eup %1941  ;;  %v1472_v22 = vsel %vm1465_vm0, %v2392_v3, %v1940_v50  ;;  %v943_v10 = vsub.f32 0.0, %v927_v51  ;;  %v1350_v41 = vmul.f32 %v2711_v33, %v1349_v55 }
 0x33a   : > { %v1215_v0 = vsub.f32 0.0, %v1199_v56  ;;  %1488 = vst [vmem:[%s2733_s30 + $0x30] sm:$0xff] %v1472_v22  ;;  %v1347_v63 = vmul.f32 0.6931472, %v1942_v45  ;;  %v1185_v23 = vmax.f32 %v2616_v57, 0.0  ;;  %v946_v16 = vsub.f32 0.0, %v930_v8 }
 0x33b   : > { %v1944_v19 = vpop.eup %1943  ;;  %v1441_v27 = vmul.f32 1.442695, %v1420_v2  ;;  %vm1352_vm4 = vcmp.lt.f32.partialorder %v1351_v59, 0.0004427343  ;;  %v971_v38 = vmul.f32 1.442695, %v943_v10 }
 0x33c   : > { %v1239_v24 = vmul.f32 1.442695, %v1215_v0  ;;  %v1946_v61 = vpop.eup %1945  ;;  %v1470_v3 = vsel %vm1465_vm0, %v2395_v7, %v1944_v19  ;;  %v1353_v36 = vsel %vm1352_vm4, %v1350_v41, %v1347_v63  ;;  %v928_v7 = vand.u32 2147483647, %v2789_v25 }
 0x33d   : > { %v1948_v14 = vpop.eup %1947  ;;  %1486 = vst [vmem:[%s2733_s30 + $0x20] sm:$0xff] %v1470_v3  ;;  %v1473_v39 = vsel %vm1465_vm0, %v2402_v11, %v1946_v61  ;;  %1953 = vpow2.f32 %v1441_v27  ;;  %v1409_v12 = vadd.f32 %v1353_v36, %v1185_v23  ;;  %v1082_v30 = vadd.f32 1.0, %v1081_v34 }
 0x33e   : > { %v1950_v33 = vpop.eup %1949  ;;  %1489 = vst [vmem:[%s2733_s30 + $0x38] sm:$0xff] %v1473_v39  ;;  %1955 = vpow2.f32 %v1239_v24  ;;  %v1060_v42 = vadd.f32 1.0, %v1948_v14  ;;  %v1084_v28 = vand.u32 2147483647, %v2758_v18  ;;  %v977_v20 = vmul.f32 1.442695, %v946_v16 }
 0x33f   : > { %v1105_v57 = vadd.f32 1.0, %v1950_v33  ;;  %v1425_v1 = vadd.f32 %v2499_v60, %v1409_v12  ;;  %v910_v26 = vmax.f32 %v2592_v46, 0.0  ;;  %v944_v49 = vsub.f32 0.0, %v928_v7  ;;  %v2829_v12 = vld [vmem:[%s2982_s4 + $0x3] ss:$0 sm:$0xff] }
 0x340   : > { %1957 = vlog2.f32 %v1060_v42  ;;  %v1083_v6 = vmul.f32 %v2758_v18, %v1082_v30  ;;  %v1063_v52 = vmul.f32 -0.5, %v1948_v14  ;;  %vm1085_vm5 = vcmp.lt.f32.partialorder %v1084_v28, 0.0004427343 }
 0x341   : > { %1959 = vlog2.f32 %v1105_v57  ;;  %v1451_v32 = vmul.f32 1.442695, %v1425_v1  ;;  %v1108_v53 = vmul.f32 -0.5, %v1950_v33  ;;  %v973_v40 = vmul.f32 1.442695, %v944_v49 }
 0x342   : > { %v1952_v11 = vpop.eup %1951  ;;  %1961 = vpow2.f32 %v971_v38  ;;  %v1064_v56 = vadd.f32 1.0, %v1063_v52  ;;  %v1066_v18 = vand.u32 2147483647, %v1948_v14  ;;  %v1111_v0 = vand.u32 2147483647, %v1950_v33 }
 0x343   : > { %v1080_v4 = vmul.f32 0.6931472, %v1952_v11  ;;  %1963 = vpow2.f32 %v977_v20  ;;  %v1109_v50 = vadd.f32 1.0, %v1108_v53  ;;  %v908_v22 = vmax.f32 %v2610_v58, 0.0 }
 0x344   : > { %1965 = vpow2.f32 %v1451_v32  ;;  %v1065_v19 = vmul.f32 %v1948_v14, %v1064_v56  ;;  %v913_v27 = vmax.f32 %v2704_v43, 0.0  ;;  %vm1067_vm6 = vcmp.lt.f32.partialorder %v1066_v18, 0.0004427343 }
 0x345   : > { %v1086_v48 = vsel %vm1085_vm5, %v1083_v6, %v1080_v4  ;;  %1967 = vpow2.f32 %v973_v40  ;;  %v1110_v41 = vmul.f32 %v1950_v33, %v1109_v50  ;;  %vm1112_vm7 = vcmp.lt.f32.partialorder %v1111_v0, 0.0004427343 }
 0x346   : > { %v1134_v62 = vadd.f32 %v1086_v48, %v910_v26 }
 0x347   : > { %v1954_v55 = vpop.eup %1953 }
 0x348   : > { %v1956_v59 = vpop.eup %1955  ;;  %v1471_v46 = vsel %vm1465_vm0, %v2409_v15, %v1954_v55  ;;  %v1150_v51 = vsub.f32 %v2357_v35, %v1134_v62  ;;  %v1183_v62 = vmax.f32 %v2764_v13, 0.0 }
 0x349   : > { %1487 = vst [vmem:[%s2733_s30 + $0x28] sm:$0xff] %v1471_v46  ;;  %v1327_v2 = vadd.f32 1.0, %v1956_v59  ;;  %v1330_v61 = vmul.f32 -0.5, %v1956_v59  ;;  %v1333_v20 = vand.u32 2147483647, %v1956_v59 }
 0x34a   : > { %v1958_v8 = vpop.eup %1957  ;;  %v2813_v45 = vsub.f32 %v1150_v51, %v2499_v60 }
 0x34b   : > { %v1960_v34 = vpop.eup %1959  ;;  %1969 = vlog2.f32 %v1327_v2  ;;  %v1062_v10 = vmul.f32 0.6931472, %v1958_v8  ;;  %v1331_v30 = vadd.f32 1.0, %v1330_v61  ;;  %vm1334_vm8 = vcmp.lt.f32.partialorder %v1333_v20, 0.0004427343 }
 0x34c   : > { %v1962_v15 = vpop.eup %1961  ;;  %v1202_v35 = vand.u32 2147483647, %v2813_v45  ;;  %v1107_v63 = vmul.f32 0.6931472, %v1960_v34 }
 0x34d   : > { %v2818_v24 = vpop.eup %1963  ;;  %v1068_v3 = vsel %vm1067_vm6, %v1065_v19, %v1062_v10  ;;  %v1087_v23 = vadd.f32 1.0, %v1962_v15  ;;  %v1090_v1 = vmul.f32 -0.5, %v1962_v15  ;;  %v1332_v49 = vmul.f32 %v1956_v59, %v1331_v30 }
 0x34e   : > { %v1966_v58 = vpop.eup %1965  ;;  %v1218_v16 = vsub.f32 0.0, %v1202_v35  ;;  %v1132_v39 = vadd.f32 %v1068_v3, %v908_v22  ;;  %v1113_v36 = vsel %vm1112_vm7, %v1110_v41, %v1107_v63  ;;  %v1114_v7 = vadd.f32 1.0, %v2818_v24 }
 0x34f   : > { %v1476_v43 = vsel %vm1465_vm0, %v2424_v29, %v1966_v58  ;;  %v1137_v14 = vadd.f32 %v1113_v36, %v913_v27  ;;  %1971 = vlog2.f32 %v1087_v23  ;;  %v2823_v38 = vpop.eup %1967  ;;  %v1093_v6 = vand.u32 2147483647, %v1962_v15 }
 0x350   : > { %1492 = vst [vmem:[%s2733_s30 + $0x50] sm:$0xff] %v1476_v43  ;;  %v1245_v33 = vmul.f32 1.442695, %v1218_v16  ;;  %v1148_v42 = vsub.f32 %v2829_v12, %v1132_v39  ;;  %v1096_v28 = vadd.f32 1.0, %v2823_v38  ;;  %v1091_v40 = vadd.f32 1.0, %v1090_v1 }
 0x351   : > { %v1153_v57 = vsub.f32 %v2829_v12, %v1137_v14  ;;  %v1117_v48 = vmul.f32 -0.5, %v2818_v24  ;;  %v1099_v56 = vmul.f32 -0.5, %v2823_v38  ;;  %vm2846_vm9 = vcmp.lt.f32.partialorder %v1093_v6, 0.0004427343 }
 0x352   : > { %1973 = vpow2.f32 %v1245_v33  ;;  %v2835_v29 = vsub.f32 %v1148_v42, %v2499_v60  ;;  %v1092_v8 = vmul.f32 %v1962_v15, %v1091_v40  ;;  %v1120_v13 = vand.u32 2147483647, %v2818_v24 }
 0x353   : > { %v2839_v11 = vsub.f32 %v1153_v57, %v2499_v60  ;;  %1975 = vlog2.f32 %v1114_v7  ;;  %v1118_v22 = vadd.f32 1.0, %v1117_v48  ;;  %v1100_v10 = vadd.f32 1.0, %v1099_v56 }
 0x354   : > { %v1200_v32 = vand.u32 2147483647, %v2835_v29  ;;  %1977 = vlog2.f32 %v1096_v28  ;;  %v911_v27 = vmax.f32 %v2756_v44, 0.0  ;;  %v1102_v63 = vand.u32 2147483647, %v2823_v38 }
 0x355   : > { %v1970_v26 = vpop.eup %1969  ;;  %v1205_v4 = vand.u32 2147483647, %v2839_v11  ;;  %v914_v15 = vmax.f32 %v2768_v31, 0.0  ;;  %v1119_v39 = vmul.f32 %v2818_v24, %v1118_v22  ;;  %v912_v36 = vmax.f32 %v2789_v25, 0.0 }
 0x356   : > { %v1329_v52 = vmul.f32 0.6931472, %v1970_v26  ;;  %v1216_v53 = vsub.f32 0.0, %v1200_v32  ;;  %vm1121_vm10 = vcmp.lt.f32.partialorder %v1120_v13, 0.0004427343  ;;  %v1101_v43 = vmul.f32 %v2823_v38, %v1100_v10 }
 0x357   : > { %v1221_v55 = vsub.f32 0.0, %v1205_v4  ;;  %vm1103_vm11 = vcmp.lt.f32.partialorder %v1102_v63, 0.0004427343 }
 0x358   : > { %v1335_v46 = vsel %vm1334_vm8, %v1332_v49, %v1329_v52  ;;  %v1241_v51 = vmul.f32 1.442695, %v1216_v53 }
 0x359   : > { %v1972_v18 = vpop.eup %1971  ;;  %v1407_v50 = vadd.f32 %v1335_v46, %v1183_v62  ;;  %v1251_v2 = vmul.f32 1.442695, %v1221_v55 }
 0x35a   : > { %1979 = vpow2.f32 %v1241_v51  ;;  %v1089_v0 = vmul.f32 0.6931472, %v1972_v18 }
 0x35b   : > { %v1423_v34 = vadd.f32 %v2499_v60, %v1407_v50  ;;  %1981 = vpow2.f32 %v1251_v2  ;;  %v1186_v2 = vmax.f32 %v2813_v45, 0.0  ;;  %v1184_v45 = vmax.f32 %v2835_v29, 0.0 }
 0x35c   : > { %v1974_v19 = vpop.eup %1973  ;;  %v1095_v35 = vsel %vm2846_vm9, %v1092_v8, %v1089_v0 }
 0x35d   : > { %v1976_v41 = vpop.eup %1975  ;;  %v1447_v61 = vmul.f32 1.442695, %v1423_v34  ;;  %v1354_v3 = vadd.f32 1.0, %v1974_v19  ;;  %v1135_v58 = vadd.f32 %v1095_v35, %v911_v27  ;;  %v1357_v31 = vmul.f32 -0.5, %v1974_v19 }
 0x35e   : > { %v1978_v23 = vpop.eup %1977  ;;  %v1116_v16 = vmul.f32 0.6931472, %v1976_v41  ;;  %v1360_v6 = vand.u32 2147483647, %v1974_v19 }
 0x35f   : > { %1983 = vpow2.f32 %v1447_v61  ;;  %v1098_v44 = vmul.f32 0.6931472, %v1978_v23  ;;  %v1151_v14 = vsub.f32 %v2829_v12, %v1135_v58  ;;  %v1358_v26 = vadd.f32 1.0, %v1357_v31 }
 0x360   : > { %1985 = vlog2.f32 %v1354_v3  ;;  %v1122_v33 = vsel %vm1121_vm10, %v1119_v39, %v1116_v16  ;;  %vm1361_vm12 = vcmp.lt.f32.partialorder %v1360_v6, 0.0004427343  ;;  %v1189_v39 = vmax.f32 %v2839_v11, 0.0 }
 0x361   : > { %v1138_v42 = vadd.f32 %v1122_v33, %v914_v15  ;;  %v1104_v7 = vsel %vm1103_vm11, %v1101_v43, %v1098_v44  ;;  %v2862_v30 = vsub.f32 %v1151_v14, %v2499_v60 }
 0x362   : > { %v1136_v57 = vadd.f32 %v1104_v7, %v912_v36 }
 0x363   : > { %v1154_v24 = vsub.f32 %v2829_v12, %v1138_v42  ;;  %v1203_v1 = vand.u32 2147483647, %v2862_v30 }
 0x364   : > { %v1980_v25 = vpop.eup %1979  ;;  %v1152_v32 = vsub.f32 %v2829_v12, %v1136_v57  ;;  %v1359_v12 = vmul.f32 %v1974_v19, %v1358_v26 }
 0x365   : > { %v1982_v28 = vpop.eup %1981  ;;  %v1336_v20 = vadd.f32 1.0, %v1980_v25  ;;  %v2867_v38 = vsub.f32 %v1154_v24, %v2499_v60  ;;  %v1219_v4 = vsub.f32 0.0, %v1203_v1  ;;  %v1339_v56 = vmul.f32 -0.5, %v1980_v25 }
 0x366   : > { %v1381_v49 = vadd.f32 1.0, %v1982_v28  ;;  %v2872_v48 = vsub.f32 %v1152_v32, %v2499_v60  ;;  %v1384_v51 = vmul.f32 -0.5, %v1982_v28  ;;  %v1342_v13 = vand.u32 2147483647, %v1980_v25 }
 0x367   : > { %1987 = vlog2.f32 %v1336_v20  ;;  %v1247_v52 = vmul.f32 1.442695, %v1219_v4  ;;  %v1206_v40 = vand.u32 2147483647, %v2867_v38  ;;  %v1340_v34 = vadd.f32 1.0, %v1339_v56 }
 0x368   : > { %1989 = vlog2.f32 %v1381_v49  ;;  %v1204_v50 = vand.u32 2147483647, %v2872_v48  ;;  %v1385_v10 = vadd.f32 1.0, %v1384_v51  ;;  %v1387_v27 = vand.u32 2147483647, %v1982_v28 }
 0x369   : > { %v1984_v53 = vpop.eup %1983  ;;  %1991 = vpow2.f32 %v1247_v52  ;;  %v1222_v18 = vsub.f32 0.0, %v1206_v40  ;;  %v1341_v3 = vmul.f32 %v1980_v25, %v1340_v34  ;;  %vm1343_vm13 = vcmp.lt.f32.partialorder %v1342_v13, 0.0004427343 }
 0x36a   : > { %v1986_v62 = vpop.eup %1985  ;;  %v1474_v55 = vsel %vm1465_vm0, %v2444_v5, %v1984_v53  ;;  %v1220_v8 = vsub.f32 0.0, %v1204_v50  ;;  %v1386_v23 = vmul.f32 %v1982_v28, %v1385_v10  ;;  %vm1388_vm14 = vcmp.lt.f32.partialorder %v1387_v27, 0.0004427343 }
 0x36b   : > { %1490 = vst [vmem:[%s2733_s30 + $0x40] sm:$0xff] %v1474_v55  ;;  %v1356_v46 = vmul.f32 0.6931472, %v1986_v62  ;;  %v1253_v0 = vmul.f32 1.442695, %v1222_v18  ;;  %v1187_v52 = vmax.f32 %v2862_v30, 0.0 }
 0x36c   : > { %v1249_v5 = vmul.f32 1.442695, %v1220_v8  ;;  %v1190_v8 = vmax.f32 %v2867_v38, 0.0  ;;  %v1188_v27 = vmax.f32 %v2872_v48, 0.0 }
 0x36d   : > { %v1362_v59 = vsel %vm1361_vm12, %v1359_v12, %v1356_v46  ;;  %1993 = vpow2.f32 %v1253_v0 }
 0x36e   : > { %v1410_v22 = vadd.f32 %v1362_v59, %v1186_v2  ;;  %1995 = vpow2.f32 %v1249_v5  ;;  %v2016_v2 = vld [vmem:[%s2982_s4 + $0x4] ss:$0 sm:$0xff] }
 0x370   : > { %v1426_v19 = vadd.f32 %v2499_v60, %v1410_v22 }
 0x371   : > { %v1988_v35 = vpop.eup %1987 }
 0x372   : > { %v1990_v63 = vpop.eup %1989  ;;  %v1453_v41 = vmul.f32 1.442695, %v1426_v19  ;;  %v1338_v61 = vmul.f32 0.6931472, %v1988_v35 }
 0x373   : > { %v1383_v15 = vmul.f32 0.6931472, %v1990_v63  ;;  %v1992_v58 = vpop.eup %1991 }
 0x374   : > { %1997 = vpow2.f32 %v1453_v41  ;;  %v1344_v16 = vsel %vm1343_vm13, %v1341_v3, %v1338_v61  ;;  %v1363_v43 = vadd.f32 1.0, %v1992_v58  ;;  %v1366_v57 = vmul.f32 -0.5, %v1992_v58 }
 0x375   : > { %v1408_v36 = vadd.f32 %v1344_v16, %v1184_v45  ;;  %v1389_v44 = vsel %vm1388_vm14, %v1386_v23, %v1383_v15  ;;  %v1369_v32 = vand.u32 2147483647, %v1992_v58 }
 0x376   : > { %v1413_v14 = vadd.f32 %v1389_v44, %v1189_v39  ;;  %1999 = vlog2.f32 %v1363_v43  ;;  %v1367_v28 = vadd.f32 1.0, %v1366_v57 }
 0x377   : > { %v1424_v33 = vadd.f32 %v2499_v60, %v1408_v36  ;;  %v1994_v29 = vpop.eup %1993  ;;  %vm1370_vm15 = vcmp.lt.f32.partialorder %v1369_v32, 0.0004427343 }
 0x378   : > { %v1429_v42 = vadd.f32 %v2499_v60, %v1413_v14  ;;  %v1390_v24 = vadd.f32 1.0, %v1994_v29  ;;  %v1996_v25 = vpop.eup %1995  ;;  %v1393_v60 = vmul.f32 -0.5, %v1994_v29  ;;  %v1368_v6 = vmul.f32 %v1992_v58, %v1367_v28 }
 0x379   : > { %v1449_v7 = vmul.f32 1.442695, %v1424_v33  ;;  %v1372_v11 = vadd.f32 1.0, %v1996_v25  ;;  %v1375_v49 = vmul.f32 -0.5, %v1996_v25  ;;  %v1396_v12 = vand.u32 2147483647, %v1994_v29 }
 0x37a   : > { %v1459_v31 = vmul.f32 1.442695, %v1429_v42  ;;  %v1394_v40 = vadd.f32 1.0, %v1393_v60  ;;  %v1378_v18 = vand.u32 2147483647, %v1996_v25 }
 0x37b   : > { %2001 = vpow2.f32 %v1449_v7  ;;  %v1376_v56 = vadd.f32 1.0, %v1375_v49  ;;  %vm1397_vm1 = vcmp.lt.f32.partialorder %v1396_v12, 0.0004427343 }
 0x37c   : > { %2003 = vpow2.f32 %v1459_v31  ;;  %v1395_v34 = vmul.f32 %v1994_v29, %v1394_v40  ;;  %vm1379_vm2 = vcmp.lt.f32.partialorder %v1378_v18, 0.0004427343 }
 0x37d   : > { %2005 = vlog2.f32 %v1390_v24  ;;  %v1377_v5 = vmul.f32 %v1996_v25, %v1376_v56 }
 0x37e   : > { %v1998_v1 = vpop.eup %1997  ;;  %2007 = vlog2.f32 %v1372_v11 }
 0x37f   : > { %v1477_v20 = vsel %vm1465_vm0, %v2453_v21, %v1998_v1  ;;  %v3046_v21 = vld [vmem:[#allocation8_spill] sm:$0xff] }
 0x380   : > { %1493 = vst [vmem:[%s2733_s30 + $0x58] sm:$0xff] %v1477_v20  ;;  %v2000_v26 = vpop.eup %1999 }
 0x381   : > { %v1365_v4 = vmul.f32 0.6931472, %v2000_v26 }
 0x383   : > { %v1371_v53 = vsel %vm1370_vm15, %v1368_v6, %v1365_v4 }
 0x384   : > { %v1411_v55 = vadd.f32 %v1371_v53, %v1187_v52 }
 0x385   : > { %v2002_v62 = vpop.eup %2001 }
 0x386   : > { %v2004_v46 = vpop.eup %2003  ;;  %v1475_v51 = vsel %vm1465_vm0, %v3046_v21, %v2002_v62  ;;  %v1427_v59 = vadd.f32 %v2016_v2, %v1411_v55 }
 0x387   : > { %v2006_v50 = vpop.eup %2005  ;;  %1491 = vst [vmem:[%s2733_s30 + $0x48] sm:$0xff] %v1475_v51  ;;  %v1480_v30 = vsel %vm1465_vm0, %v2631_v17, %v2004_v46 }
 0x388   : > { %v2008_v0 = vpop.eup %2007  ;;  %1496 = vst [vmem:[%s2733_s30 + $0x70] sm:$0xff] %v1480_v30  ;;  %v1392_v22 = vmul.f32 0.6931472, %v2006_v50  ;;  %v1455_v13 = vmul.f32 1.442695, %v1427_v59 }
 0x389   : > { %v1374_v10 = vmul.f32 0.6931472, %v2008_v0 }
 0x38a   : > { %v1398_v19 = vsel %vm1397_vm1, %v1395_v34, %v1392_v22  ;;  %2009 = vpow2.f32 %v1455_v13 }
 0x38b   : > { %v1414_v17 = vadd.f32 %v1398_v19, %v1190_v8  ;;  %v1380_v35 = vsel %vm1379_vm2, %v1377_v5, %v1374_v10 }
 0x38c   : > { %v1412_v63 = vadd.f32 %v1380_v35, %v1188_v27 }
 0x38d   : > { %v1430_v41 = vadd.f32 %v2016_v2, %v1414_v17 }
 0x38e   : > { %v1428_v38 = vadd.f32 %v2016_v2, %v1412_v63 }
 0x38f   : > { %v1461_v61 = vmul.f32 1.442695, %v1430_v41 }
 0x390   : > { %v1457_v3 = vmul.f32 1.442695, %v1428_v38 }
 0x391   : > { %2011 = vpow2.f32 %v1461_v61 }
 0x392   : > { %2013 = vpow2.f32 %v1457_v3 }
 0x394   : > { %v2010_v45 = vpop.eup %2009 }
 0x395   : > { %v1478_v15 = vsel %vm1465_vm0, %v2741_v47, %v2010_v45 }
 0x396   : > { %1494 = vst [vmem:[%s2733_s30 + $0x60] sm:$0xff] %v1478_v15 }
 0x398   : > { %1505 = sbr.rel (!%p3047_p6) target bundleno = 955 (0x3bb), region = 48 }
 0x39b   : > { %v2012_v48 = vpop.eup %2011 }
 0x39c   : > { %v2014_v23 = vpop.eup %2013  ;;  %v1481_v58 = vsel %vm1465_vm0, %v2750_v54, %v2012_v48 }
 0x39d   : > { %1497 = vst [vmem:[%s2733_s30 + $0x78] sm:$0xff] %v1481_v58  ;;  %v1479_v16 = vsel %vm1465_vm0, %v2774_v9, %v2014_v23 }
 0x39e   : > { %1495 = vst [vmem:[%s2733_s30 + $0x68] sm:$0xff] %v1479_v16 }
 0x39f   : > { %s3054_s16 = smov (!%p1508_p9, %s1507_s16), 16 }
 0x3a0   : > { %s2922_s23 = sshll.u32 %s3054_s16, 7 }
 0x3a1   : > { %s1512_s25 = ssub.s32 2048, %s2922_s23 }
 0x3a2   : > { %1513 = vsyncadd %s2917_s15, %s1512_s25  ;;  %p1643_p10 = scmp.ne.s32.totalorder %s2922_s23, 0  ;;  %s1649_s17 = sshll.u32 %s2170_s22, 11 }
 0x3a3   : > { %s2931_s8 = scalar_lea.hbm %s2983_s5, %s1649_s17  ;;  %s1518_s6 = sshll.u32 %s2733_s30, 4  ;;  %s2934_s6 = int_to_ptr.vmem [resolvable:$true] %s1518_s6 }
 0x3a4   : > { %s2045_s9 = scalar_lea.vmem %s2934_s6, %s2922_s23  ;;  %s2116_s10 = smov [#allocation5]  }
 0x3a5   : > { %p2046_p12 = scmp.ne.s32.totalorder %s2934_s6, %s2045_s9  ;;  %s2049_s11 = sshll.u32 %s2116_s10, 4  ;;  %s2050_s11 = int_to_ptr.vmem [resolvable:$false] %s2049_s11 }
 0x3a6   : > { %s2051_s22 = scalar_lea.vmem %s2050_s11, 4096  ;;  %p2052_p4 = scmp.lt.s32.totalorder %s2934_s6, %s2050_s11 }
 0x3a7   : > { %p2047_p2 = pnand %p2046_p12, %p1643_p10  ;;  %p2053_p7 = scmp.lt.s32.totalorder %s2051_s22, %s2045_s9 }
 0x3a9   : > { %p2048_p3 = pneg %p2047_p2  ;;  %p2054_p8 = por %p2053_p7, %p2052_p4 }
 0x3ab   : > { %p2055_p11 = pnand %p2054_p8, %p2048_p3 }
 0x3ad   : > { %2058 = shalt.err (!%p2055_p11)
}
 0x3ae   : > { %s2059_s30 = scalar_lea.hbm %s2931_s8, %s2922_s23  ;;  %s2063_s13 = scalar_lea.hbm %s2983_s5, 3200 }
 0x3af   : > { %p2060_p13 = scmp.ne.s32.totalorder %s2931_s8, %s2059_s30  ;;  %p2064_p5 = scmp.lt.u32.totalorder %s2931_s8, %s2983_s5 }
 0x3b0   : > { %p2065_p6 = scmp.lt.u32.totalorder %s2063_s13, %s2059_s30  ;;  %p2067_p12 = scmp.lt.u32.totalorder %s2059_s30, %s2931_s8 }
 0x3b1   : > { %p2061_p1 = pnand %p2060_p13, %p1643_p10 }
 0x3b2   : > { %p2066_p9 = por %p2065_p6, %p2064_p5 }
 0x3b3   : > { %p2062_p0 = pneg %p2061_p1 }
 0x3b4   : > { %p2068_p2 = por %p2067_p12, %p2066_p9 }
 0x3b6   : > { %p2069_p3 = pnand %p2068_p2, %p2062_p0 }
 0x3b8   : > { %2072 = shalt.err (!%p2069_p3)
}
 0x3b9   : > { %s2117_s25 = smov 128   ;;  %s2118_s17 = smov 8  }
 0x3ba   : > { %1524 = dma.vmem_to_hbm [thread:$0]  (%p1643_p10), %s2934_s6, %s2922_s23, %s2931_s8, %s2917_s15, %s2117_s25, %s2117_s25, %s2118_s17  }
 0x3bb PF: > { %p1791_p4 = scmp.ge.s32.totalorder %s2111_s21, 2  ;;  %s1533_s26 = sand.u32 1, %s2099_s18  }
 0x3bc   : > { %p3048_p7 = scmp.ne.s32.totalorder %s2988_s29, 0  ;;  %s1534_s28 = scalar_lea.sflag [#allocation4], %s1533_s26 }
 0x3be   : > { %p1786_p8 = pnand %p1791_p4, %p3048_p7 }
 0x3c0   : > { %2094 = dma.done.wait (!%p1786_p8), %s1534_s28, 2048  }
 0x3c1   : > { %2096 = vsyncadd (!%p1786_p8), %s1534_s28, 4294965248  ;;  %p16_p11 = scmp.ge.s32.totalorder %s2174_s24, 4   ;;  %s3049_s18 = smov %s2103_s19 }
 0x3c2   : > { %s3050_s19 = smov %s2107_s20  ;;  %s3051_s20 = smov %s2185_s27 }
 0x3c3   : > { %s3052_s21 = smov %s2174_s24  ;;  %18 = sbr.rel (!%p16_p11) target bundleno = 4 (0x4), region = 80 }
 0x3ca   :  { %1539 = vsyncpa [#allocation3], 1 }
 0x3cb   :  { %1541 = vsyncpa [#allocation3 + $0x1], 1 }
 0x3cc   :  { %1542 = vsyncpa [#allocation4], 1 }
 0x3cd   :  { %1544 = vsyncpa [#allocation4 + $0x1], 1 }

</bundles_post_ra>
